<compile_context>
chip_gen: v7x
topology: tpu7x:2x2x1
jax: 0.10.0
libtpu: 0.0.40
codegen_flags: <defaults>
</compile_context>

<pallas_src>
import functools
import math

import jax
import jax.numpy as jnp
import numpy as np
from jax.experimental import pallas as pl
from jax.experimental.pallas import tpu as pltpu

# MXU operand dtype.  Elementwise BN/ReLU math and all accumulation stay f32.
_MATMUL_DTYPE = jnp.bfloat16


def _round_up(x, m):
    return ((x + m - 1) // m) * m


# --------------------------------------------------------------------------
# Fused kernel
# --------------------------------------------------------------------------
def _transition_kernel(x_ref, s1_ref, b1_ref, w1_ref, b2_ref, wd_ref,
                       o_ref, h_scr):
    # x_ref : (8, tm, Cin)   8 = flattened (kd,kh,kw) space-to-depth taps
    # s1/b1 : (1, Cin)       BN1 folded scale / bias (f32)
    # w1    : (Cin, Cp)      conv1 weight with BN2 scale folded (bf16, padded)
    # b2    : (1, Cp)        BN2 folded bias (f32, padded lanes are 0)
    # wd    : (8*Cp, Cp)     conv_down weight stacked along K (bf16, padded)
    # o_ref : (tm, Cp)       f32 output block
    # h_scr : (tm, 8*Cp)     VMEM scratch holding the conv_down LHS (bf16)
    _, tm, cin = x_ref.shape
    cp = o_ref.shape[1]

    # BN1 + ReLU + conv1 + BN2 + ReLU, once, on the flattened (8*tm, Cin) view.
    x = x_ref[...].reshape(8 * tm, cin)                       # free reshape
    h = jnp.maximum(x * s1_ref[...] + b1_ref[...], 0.0)       # f32 VPU
    h1 = jnp.dot(h.astype(_MATMUL_DTYPE), w1_ref[...],
                 preferred_element_type=jnp.float32)          # (8*tm, Cp)
    h1 = jnp.maximum(h1 + b2_ref[...], 0.0).astype(_MATMUL_DTYPE)

    # Re-arrange k-major rows into a (tm, 8*Cp) LHS: slab k -> columns k*Cp..
    for k in range(8):                                        # static unroll
        h_scr[:, k * cp:(k + 1) * cp] = h1[k * tm:(k + 1) * tm, :]

    # 2x2x2 / stride-2 conv as ONE matmul with K = 8*Cp (MXU-internal accum).
    o_ref[...] = jnp.dot(h_scr[...], wd_ref[...],
                         preferred_element_type=jnp.float32).astype(o_ref.dtype)


# --------------------------------------------------------------------------
# VMEM planning
# --------------------------------------------------------------------------
@functools.lru_cache(maxsize=None)
def _vmem_capacity_bytes():
    try:
        return int(pltpu.get_tpu_info().vmem_capacity_bytes)
    except Exception:
        pass
    try:
        kind = jax.devices()[0].device_kind.lower()
        if ("v4" in kind) or ("v5" in kind) or ("v6" in kind):
            return 128 * 1024 * 1024
    except Exception:
        pass
    return 64 * 1024 * 1024          # conservative (v7x-class per-core VMEM)


def _pick_tile(m2, cin, cp, budget_bytes, weight_bufs):
    """Largest power-of-two row tile fitting the VMEM budget."""
    bpe = jnp.dtype(_MATMUL_DTYPE).itemsize
    w_bytes = weight_bufs * (cin * cp * bpe          # w1 (bf16)
                             + 8 * cp * cp * bpe     # wd (bf16)
                             + (2 * cin + cp) * 4)   # s1, b1, b2 (f32)
    tm = 8
    for cand in (4096, 2048, 1024, 512, 256, 128, 64, 32, 16, 8):
        per_step = (2 * 8 * cand * cin * 4           # input block, 2x buffered
                    + 2 * cand * cp * 4              # output block, 2x buffered
                    + cand * 8 * cp * bpe            # (tm, 8*Cp) scratch
                    + 8 * cand * cin * 4             # BN1/ReLU temp (f32)
                    + 8 * cand * cp * (4 + bpe))     # conv1 result f32 + bf16
        if w_bytes + per_step <= budget_bytes:
            tm = cand
            break
    # Megacore / pipeline ramp: prefer >= 4 grid steps when the rows allow it.
    while tm > 8 and pl.cdiv(m2, tm) < 4:
        tm //= 2
    return tm


# --------------------------------------------------------------------------
# Parameter prep (hoisted out of the per-call path)
# --------------------------------------------------------------------------
def prepare_params(params, eps=1e-5):
    (g1, be1, rm1, rv1, w1, g2, be2, rm2, rv2, wd) = params
    cout, cin = int(w1.shape[0]), int(w1.shape[1])
    cp = _round_up(cout, 128)

    # TODO(synk): BatchNorm implemented in inference mode (running statistics);
    # PyTorch training-mode batch statistics are not computed in-kernel.
    s1 = g1 / jnp.sqrt(rv1 + eps)
    b1 = be1 - rm1 * s1
    s2 = g2 / jnp.sqrt(rv2 + eps)
    b2 = be2 - rm2 * s2

    # conv1 (O, I, 1,1,1) -> (I, O), fold BN2 scale, pad lanes to Cp, cast bf16.
    w1_mat = w1.reshape(cout, cin).T * s2[None, :]
    w1_pad = (jnp.zeros((cin, cp), jnp.float32).at[:, :cout].set(w1_mat)
              .astype(_MATMUL_DTYPE))
    b2_pad = jnp.zeros((1, cp), jnp.float32).at[0, :cout].set(b2)

    # conv_down (O, I, kd,kh,kw) -> (k, I, O) stacked to (8*Cp, Cp), bf16.
    wd_t = jnp.transpose(wd, (2, 3, 4, 1, 0)).reshape(8, cout, cout)
    wd_pad = jnp.zeros((8, cp, cp), jnp.float32).at[:, :cout, :cout].set(wd_t)
    wd_stack = wd_pad.reshape(8 * cp, cp).astype(_MATMUL_DTYPE)

    prepped = (s1.reshape(1, cin).astype(jnp.float32),
               b1.reshape(1, cin).astype(jnp.float32),
               w1_pad, b2_pad, wd_stack)
    return prepped, cout


# --------------------------------------------------------------------------
# Forward
# --------------------------------------------------------------------------
@functools.partial(
    jax.jit, static_argnames=("cout", "single_buffer", "channels_last_out"))
def _forward(x, s1, b1, w1, b2, wd, *, cout, single_buffer, channels_last_out):
    n, cin, d, h, w = x.shape
    cp = w1.shape[1]
    d2, h2, w2 = d // 2, h // 2, w // 2
    m2 = n * d2 * h2 * w2

    # ---- trace-time planning (per-generation VMEM budget, tile, grid) ----
    mib = 1024 * 1024
    cap = _vmem_capacity_bytes()
    if cap >= 128 * mib:
        vmem_limit = 100 * mib                                 # v5e / v6e
    else:
        vmem_limit = max(32 * mib, min(56 * mib, cap - 8 * mib))  # v7x-class
    tm = _pick_tile(m2, cin, cp, budget_bytes=(vmem_limit * 2) // 3,
                    weight_bufs=1 if single_buffer else 2)
    tiles = pl.cdiv(m2, tm)
    if tiles > 1 and tiles % 2:
        tiles += 1                     # even tile count -> balanced megacore
    m2p = tiles * tm

    # ---- single input layout change: NCDHW -> (kd,kh,kw, n,d2,h2,w2, c) ----
    # TODO(synk): in a channel-last (NDHWC) network this transpose and the
    # output transpose below disappear; they are kept only because the PyTorch
    # module boundary is NCDHW.
    x = x[:, :, :2 * d2, :2 * h2, :2 * w2]
    xr = x.reshape(n, cin, d2, 2, h2, 2, w2, 2)
    xr = jnp.transpose(xr, (3, 5, 7, 0, 2, 4, 6, 1)).reshape(8, m2, cin)
    if m2p != m2:
        xr = jnp.pad(xr, ((0, 0), (0, m2p - m2), (0, 0)))

    const_kw = {}
    if single_buffer:
        # Constant operands: request single buffering (index_map is constant).
        const_kw["pipeline_mode"] = pl.Buffered(1)

    def const_spec(shape):
        return pl.BlockSpec(shape, lambda i: (0, 0), **const_kw)

    out = pl.pallas_call(
        _transition_kernel,
        out_shape=jax.ShapeDtypeStruct((m2p, cp), jnp.float32),
        grid_spec=pltpu.PrefetchScalarGridSpec(
            num_scalar_prefetch=0,
            grid=(tiles,),
            in_specs=[
                pl.BlockSpec((8, tm, cin), lambda i: (0, i, 0)),
                const_spec((1, cin)),
                const_spec((1, cin)),
                const_spec((cin, cp)),
                const_spec((1, cp)),
                const_spec((8 * cp, cp)),
            ],
            out_specs=pl.BlockSpec((tm, cp), lambda i: (i, 0)),
            scratch_shapes=[pltpu.VMEM((tm, 8 * cp), _MATMUL_DTYPE)],
        ),
        compiler_params=pltpu.CompilerParams(
            dimension_semantics=("parallel",),
            vmem_limit_bytes=vmem_limit,
        ),
    )(xr, s1, b1, w1, b2, wd)

    out = out[:m2, :cout].reshape(n, d2, h2, w2, cout)
    if channels_last_out:
        return out                                            # NDHWC (cheap)
    return jnp.transpose(out, (0, 4, 1, 2, 3))                # NCDHW (spec)


_BUFFERED1_OK = [hasattr(pl, "Buffered")]


def transition_forward(x, prepped, cout, channels_last_out=False):
    s1, b1, w1, b2, wd = prepped
    if _BUFFERED1_OK[0]:
        try:
            return _forward(x, s1, b1, w1, b2, wd, cout=cout,
                            single_buffer=True,
                            channels_last_out=channels_last_out)
        except Exception:
            # Running JAX rejects Buffered(1): fall back to default buffering.
            _BUFFERED1_OK[0] = False
    return _forward(x, s1, b1, w1, b2, wd, cout=cout,
                    single_buffer=False,
                    channels_last_out=channels_last_out)


# --------------------------------------------------------------------------
# Pure-JAX reference (for correctness check)
# --------------------------------------------------------------------------
def transition_reference(x, params, eps=1e-5):
    (g1, be1, rm1, rv1, w1, g2, be2, rm2, rv2, wd) = params

    def bn(h, g, b, rm, rv):
        sh = (1, -1, 1, 1, 1)
        return (h - rm.reshape(sh)) / jnp.sqrt(rv.reshape(sh) + eps) \
            * g.reshape(sh) + b.reshape(sh)

    dn = ("NCDHW", "OIDHW", "NCDHW")
    h = jnp.maximum(bn(x, g1, be1, rm1, rv1), 0.0)
    h = jax.lax.conv_general_dilated(h, w1, (1, 1, 1), "VALID",
                                     dimension_numbers=dn)
    h = jnp.maximum(bn(h, g2, be2, rm2, rv2), 0.0)
    return jax.lax.conv_general_dilated(h, wd, (2, 2, 2), "VALID",
                                        dimension_numbers=dn)


# --------------------------------------------------------------------------
def make_params(key, inchannel, reduction):
    outchannel = int(math.floor(inchannel * reduction))
    ks = jax.random.split(key, 10)
    g1 = jax.random.uniform(ks[0], (inchannel,), jnp.float32, 0.5, 1.5)
    be1 = 0.1 * jax.random.normal(ks[1], (inchannel,), jnp.float32)
    rm1 = 0.1 * jax.random.normal(ks[2], (inchannel,), jnp.float32)
    rv1 = jax.random.uniform(ks[3], (inchannel,), jnp.float32, 0.5, 1.5)
    w1 = jax.random.normal(ks[4], (outchannel, inchannel, 1, 1, 1),
                           jnp.float32) * jnp.sqrt(2.0 / inchannel)
    g2 = jax.random.uniform(ks[5], (outchannel,), jnp.float32, 0.5, 1.5)
    be2 = 0.1 * jax.random.normal(ks[6], (outchannel,), jnp.float32)
    rm2 = 0.1 * jax.random.normal(ks[7], (outchannel,), jnp.float32)
    rv2 = jax.random.uniform(ks[8], (outchannel,), jnp.float32, 0.5, 1.5)
    wd = jax.random.normal(ks[9], (outchannel, outchannel, 2, 2, 2),
                           jnp.float32) * jnp.sqrt(2.0 / (outchannel * 8))
    return (g1, be1, rm1, rv1, w1, g2, be2, rm2, rv2, wd)


if __name__ == "__main__":
    N, Cin, D, H, W = 2, 32, 8, 8, 8
    reduction = 0.5

    key = jax.random.PRNGKey(0)
    kx, kp = jax.random.split(key)
    x = jax.random.normal(kx, (N, Cin, D, H, W), jnp.float32)
    params = make_params(kp, Cin, reduction)

    prepped, cout = prepare_params(params)        # hoisted out of the hot path
    prepped = jax.tree_util.tree_map(jax.block_until_ready, prepped)

    out = jax.block_until_ready(transition_forward(x, prepped, cout))

    ref = jax.block_until_ready(transition_reference(x, params))
    assert out.shape == ref.shape, (out.shape, ref.shape)
    # bf16 MXU operands -> relaxed tolerance (scaled to output dynamic range).
    scale = float(jnp.max(jnp.abs(ref)))
    np.testing.assert_allclose(np.asarray(out), np.asarray(ref),
                               rtol=2e-2, atol=2e-2 * scale)
    print("KERNEL_OK")
</pallas_src>

<mosaic_0001>
module attributes {stable_mosaic.version = 11 : i64} {
  func.func @_transition_kernel(%arg0: i32, %arg1: memref<8x32x32xf32, #tpu.memory_space<vmem>>, %arg2: memref<1x32xf32, #tpu.memory_space<vmem>>, %arg3: memref<1x32xf32, #tpu.memory_space<vmem>>, %arg4: memref<32x128xbf16, #tpu.memory_space<vmem>>, %arg5: memref<1x128xf32, #tpu.memory_space<vmem>>, %arg6: memref<1024x128xbf16, #tpu.memory_space<vmem>>, %arg7: memref<32x128xf32, #tpu.memory_space<vmem>>, %arg8: memref<32x1024xbf16, #tpu.memory_space<vmem>>) attributes {dimension_semantics = [#tpu.dimension_semantics<parallel>], iteration_bounds = array<i64: 4>, scalar_prefetch = 0 : i64, scratch_operands = 1 : i64, tpu.core_type = #tpu.core_type<tc>, window_params = [{transform_indices = @transform_0, window_bounds = array<i64: 8, 32, 32>}, {pipeline_mode = #tpu.pipeline_mode<synchronous>, transform_indices = @transform_1, window_bounds = array<i64: 1, 32>}, {pipeline_mode = #tpu.pipeline_mode<synchronous>, transform_indices = @transform_2, window_bounds = array<i64: 1, 32>}, {pipeline_mode = #tpu.pipeline_mode<synchronous>, transform_indices = @transform_3, window_bounds = array<i64: 32, 128>}, {pipeline_mode = #tpu.pipeline_mode<synchronous>, transform_indices = @transform_4, window_bounds = array<i64: 1, 128>}, {pipeline_mode = #tpu.pipeline_mode<synchronous>, transform_indices = @transform_5, window_bounds = array<i64: 1024, 128>}, {transform_indices = @transform_6, window_bounds = array<i64: 32, 128>}]} {
    %c0 = arith.constant 0 : index
    %c0_0 = arith.constant 0 : index
    %c0_1 = arith.constant 0 : index
    %0 = vector.load %arg1[%c0, %c0_0, %c0_1] : memref<8x32x32xf32, #tpu.memory_space<vmem>>, vector<8x32x32xf32>
    %1 = vector.shape_cast %0 : vector<8x32x32xf32> to vector<256x32xf32>
    %c0_2 = arith.constant 0 : index
    %c0_3 = arith.constant 0 : index
    %2 = vector.load %arg2[%c0_2, %c0_3] : memref<1x32xf32, #tpu.memory_space<vmem>>, vector<1x32xf32>
    %3 = vector.broadcast %2 : vector<1x32xf32> to vector<256x32xf32>
    %4 = arith.mulf %1, %3 : vector<256x32xf32>
    %c0_4 = arith.constant 0 : index
    %c0_5 = arith.constant 0 : index
    %5 = vector.load %arg3[%c0_4, %c0_5] : memref<1x32xf32, #tpu.memory_space<vmem>>, vector<1x32xf32>
    %6 = vector.broadcast %5 : vector<1x32xf32> to vector<256x32xf32>
    %7 = arith.addf %4, %6 : vector<256x32xf32>
    %cst = arith.constant 0.000000e+00 : f32
    %8 = vector.broadcast %cst : f32 to vector<256x32xf32>
    %9 = arith.maximumf %7, %8 : vector<256x32xf32>
    %10 = arith.truncf %9 : vector<256x32xf32> to vector<256x32xbf16>
    %c0_6 = arith.constant 0 : index
    %c0_7 = arith.constant 0 : index
    %11 = vector.load %arg4[%c0_6, %c0_7] : memref<32x128xbf16, #tpu.memory_space<vmem>>, vector<32x128xbf16>
    %cst_8 = arith.constant dense<0.000000e+00> : vector<256x128xf32>
    %12 = tpu.matmul %10, %11, %cst_8 {dimension_numbers = #tpu.dot_dimension_numbers<[1], [0], [0], [1], [0, 0, 1, 1], [], []>} : vector<256x32xbf16>, vector<32x128xbf16>, vector<256x128xf32> -> vector<256x128xf32>
    %c0_9 = arith.constant 0 : index
    %c0_10 = arith.constant 0 : index
    %13 = vector.load %arg5[%c0_9, %c0_10] : memref<1x128xf32, #tpu.memory_space<vmem>>, vector<1x128xf32>
    %14 = vector.broadcast %13 : vector<1x128xf32> to vector<256x128xf32>
    %15 = arith.addf %12, %14 : vector<256x128xf32>
    %cst_11 = arith.constant 0.000000e+00 : f32
    %16 = vector.broadcast %cst_11 : f32 to vector<256x128xf32>
    %17 = arith.maximumf %15, %16 : vector<256x128xf32>
    %18 = arith.truncf %17 : vector<256x128xf32> to vector<256x128xbf16>
    %19 = vector.extract_strided_slice %18 {offsets = [0, 0], sizes = [32, 128], strides = [1, 1]} : vector<256x128xbf16> to vector<32x128xbf16>
    %c0_12 = arith.constant 0 : index
    %c0_13 = arith.constant 0 : index
    %20 = vector.load %arg8[%c0_12, %c0_13] : memref<32x1024xbf16, #tpu.memory_space<vmem>>, vector<32x128xbf16>
    tpu.vector_store %arg8[%c0_12, %c0_13], %19 {strides = array<i32>} : memref<32x1024xbf16, #tpu.memory_space<vmem>>, vector<32x128xbf16>,
    %21 = vector.extract_strided_slice %18 {offsets = [32, 0], sizes = [32, 128], strides = [1, 1]} : vector<256x128xbf16> to vector<32x128xbf16>
    %c0_14 = arith.constant 0 : index
    %c128 = arith.constant 128 : index
    %22 = vector.load %arg8[%c0_14, %c128] : memref<32x1024xbf16, #tpu.memory_space<vmem>>, vector<32x128xbf16>
    tpu.vector_store %arg8[%c0_14, %c128], %21 {strides = array<i32>} : memref<32x1024xbf16, #tpu.memory_space<vmem>>, vector<32x128xbf16>,
    %23 = vector.extract_strided_slice %18 {offsets = [64, 0], sizes = [32, 128], strides = [1, 1]} : vector<256x128xbf16> to vector<32x128xbf16>
    %c0_15 = arith.constant 0 : index
    %c256 = arith.constant 256 : index
    %24 = vector.load %arg8[%c0_15, %c256] : memref<32x1024xbf16, #tpu.memory_space<vmem>>, vector<32x128xbf16>
    tpu.vector_store %arg8[%c0_15, %c256], %23 {strides = array<i32>} : memref<32x1024xbf16, #tpu.memory_space<vmem>>, vector<32x128xbf16>,
    %25 = vector.extract_strided_slice %18 {offsets = [96, 0], sizes = [32, 128], strides = [1, 1]} : vector<256x128xbf16> to vector<32x128xbf16>
    %c0_16 = arith.constant 0 : index
    %c384 = arith.constant 384 : index
    %26 = vector.load %arg8[%c0_16, %c384] : memref<32x1024xbf16, #tpu.memory_space<vmem>>, vector<32x128xbf16>
    tpu.vector_store %arg8[%c0_16, %c384], %25 {strides = array<i32>} : memref<32x1024xbf16, #tpu.memory_space<vmem>>, vector<32x128xbf16>,
    %27 = vector.extract_strided_slice %18 {offsets = [128, 0], sizes = [32, 128], strides = [1, 1]} : vector<256x128xbf16> to vector<32x128xbf16>
    %c0_17 = arith.constant 0 : index
    %c512 = arith.constant 512 : index
    %28 = vector.load %arg8[%c0_17, %c512] : memref<32x1024xbf16, #tpu.memory_space<vmem>>, vector<32x128xbf16>
    tpu.vector_store %arg8[%c0_17, %c512], %27 {strides = array<i32>} : memref<32x1024xbf16, #tpu.memory_space<vmem>>, vector<32x128xbf16>,
    %29 = vector.extract_strided_slice %18 {offsets = [160, 0], sizes = [32, 128], strides = [1, 1]} : vector<256x128xbf16> to vector<32x128xbf16>
    %c0_18 = arith.constant 0 : index
    %c640 = arith.constant 640 : index
    %30 = vector.load %arg8[%c0_18, %c640] : memref<32x1024xbf16, #tpu.memory_space<vmem>>, vector<32x128xbf16>
    tpu.vector_store %arg8[%c0_18, %c640], %29 {strides = array<i32>} : memref<32x1024xbf16, #tpu.memory_space<vmem>>, vector<32x128xbf16>,
    %31 = vector.extract_strided_slice %18 {offsets = [192, 0], sizes = [32, 128], strides = [1, 1]} : vector<256x128xbf16> to vector<32x128xbf16>
    %c0_19 = arith.constant 0 : index
    %c768 = arith.constant 768 : index
    %32 = vector.load %arg8[%c0_19, %c768] : memref<32x1024xbf16, #tpu.memory_space<vmem>>, vector<32x128xbf16>
    tpu.vector_store %arg8[%c0_19, %c768], %31 {strides = array<i32>} : memref<32x1024xbf16, #tpu.memory_space<vmem>>, vector<32x128xbf16>,
    %33 = vector.extract_strided_slice %18 {offsets = [224, 0], sizes = [32, 128], strides = [1, 1]} : vector<256x128xbf16> to vector<32x128xbf16>
    %c0_20 = arith.constant 0 : index
    %c896 = arith.constant 896 : index
    %34 = vector.load %arg8[%c0_20, %c896] : memref<32x1024xbf16, #tpu.memory_space<vmem>>, vector<32x128xbf16>
    tpu.vector_store %arg8[%c0_20, %c896], %33 {strides = array<i32>} : memref<32x1024xbf16, #tpu.memory_space<vmem>>, vector<32x128xbf16>,
    %c0_21 = arith.constant 0 : index
    %c0_22 = arith.constant 0 : index
    %35 = vector.load %arg8[%c0_21, %c0_22] : memref<32x1024xbf16, #tpu.memory_space<vmem>>, vector<32x1024xbf16>
    %c0_23 = arith.constant 0 : index
    %c0_24 = arith.constant 0 : index
    %36 = vector.load %arg6[%c0_23, %c0_24] : memref<1024x128xbf16, #tpu.memory_space<vmem>>, vector<1024x128xbf16>
    %cst_25 = arith.constant dense<0.000000e+00> : vector<32x128xf32>
    %37 = tpu.matmul %35, %36, %cst_25 {dimension_numbers = #tpu.dot_dimension_numbers<[1], [0], [0], [1], [0, 0, 1, 1], [], []>} : vector<32x1024xbf16>, vector<1024x128xbf16>, vector<32x128xf32> -> vector<32x128xf32>
    %c0_26 = arith.constant 0 : index
    %c0_27 = arith.constant 0 : index
    %38 = vector.load %arg7[%c0_26, %c0_27] : memref<32x128xf32, #tpu.memory_space<vmem>>, vector<32x128xf32>
    tpu.vector_store %arg7[%c0_26, %c0_27], %37 {strides = array<i32>} : memref<32x128xf32, #tpu.memory_space<vmem>>, vector<32x128xf32>,
    return
  }
  func.func @transform_0(%arg0: i32) -> (i32, i32, i32) {
    %c0_i32 = arith.constant 0 : i32
    %c0_i32_0 = arith.constant 0 : i32
    %c0_i32_1 = arith.constant 0 : i32
    return %c0_i32, %arg0, %c0_i32_0 : i32, i32, i32
  }
  func.func @transform_1(%arg0: i32) -> (i32, i32) {
    %c0_i32 = arith.constant 0 : i32
    %c0_i32_0 = arith.constant 0 : i32
    %c0_i32_1 = arith.constant 0 : i32
    return %c0_i32, %c0_i32_0 : i32, i32
  }
  func.func @transform_2(%arg0: i32) -> (i32, i32) {
    %c0_i32 = arith.constant 0 : i32
    %c0_i32_0 = arith.constant 0 : i32
    %c0_i32_1 = arith.constant 0 : i32
    return %c0_i32, %c0_i32_0 : i32, i32
  }
  func.func @transform_3(%arg0: i32) -> (i32, i32) {
    %c0_i32 = arith.constant 0 : i32
    %c0_i32_0 = arith.constant 0 : i32
    %c0_i32_1 = arith.constant 0 : i32
    return %c0_i32, %c0_i32_0 : i32, i32
  }
  func.func @transform_4(%arg0: i32) -> (i32, i32) {
    %c0_i32 = arith.constant 0 : i32
    %c0_i32_0 = arith.constant 0 : i32
    %c0_i32_1 = arith.constant 0 : i32
    return %c0_i32, %c0_i32_0 : i32, i32
  }
  func.func @transform_5(%arg0: i32) -> (i32, i32) {
    %c0_i32 = arith.constant 0 : i32
    %c0_i32_0 = arith.constant 0 : i32
    %c0_i32_1 = arith.constant 0 : i32
    return %c0_i32, %c0_i32_0 : i32, i32
  }
  func.func @transform_6(%arg0: i32) -> (i32, i32) {
    %c0_i32 = arith.constant 0 : i32
    %c0_i32_0 = arith.constant 0 : i32
    return %arg0, %c0_i32 : i32, i32
  }
}

module attributes {stable_mosaic.version = 11 : i64} {
  func.func @_transition_kernel(%arg0: i32, %arg1: memref<8x32x32xf32, #tpu.memory_space<vmem>>, %arg2: memref<1x32xf32, #tpu.memory_space<vmem>>, %arg3: memref<1x32xf32, #tpu.memory_space<vmem>>, %arg4: memref<32x128xbf16, #tpu.memory_space<vmem>>, %arg5: memref<1x128xf32, #tpu.memory_space<vmem>>, %arg6: memref<1024x128xbf16, #tpu.memory_space<vmem>>, %arg7: memref<32x128xf32, #tpu.memory_space<vmem>>, %arg8: memref<32x1024xbf16, #tpu.memory_space<vmem>>) attributes {dimension_semantics = [#tpu.dimension_semantics<parallel>], iteration_bounds = array<i64: 4>, scalar_prefetch = 0 : i64, scratch_operands = 1 : i64, tpu.core_type = #tpu.core_type<tc>, window_params = [{transform_indices = @transform_0, window_bounds = array<i64: 8, 32, 32>}, {pipeline_mode = #tpu.pipeline_mode<synchronous>, transform_indices = @transform_1, window_bounds = array<i64: 1, 32>}, {pipeline_mode = #tpu.pipeline_mode<synchronous>, transform_indices = @transform_2, window_bounds = array<i64: 1, 32>}, {pipeline_mode = #tpu.pipeline_mode<synchronous>, transform_indices = @transform_3, window_bounds = array<i64: 32, 128>}, {pipeline_mode = #tpu.pipeline_mode<synchronous>, transform_indices = @transform_4, window_bounds = array<i64: 1, 128>}, {pipeline_mode = #tpu.pipeline_mode<synchronous>, transform_indices = @transform_5, window_bounds = array<i64: 1024, 128>}, {transform_indices = @transform_6, window_bounds = array<i64: 32, 128>}]} {
    %c0 = arith.constant 0 : index
    %c0_0 = arith.constant 0 : index
    %c0_1 = arith.constant 0 : index
    %0 = vector.load %arg1[%c0, %c0_0, %c0_1] : memref<8x32x32xf32, #tpu.memory_space<vmem>>, vector<8x32x32xf32>
    %1 = vector.shape_cast %0 : vector<8x32x32xf32> to vector<256x32xf32>
    %c0_2 = arith.constant 0 : index
    %c0_3 = arith.constant 0 : index
    %2 = vector.load %arg2[%c0_2, %c0_3] : memref<1x32xf32, #tpu.memory_space<vmem>>, vector<1x32xf32>
    %3 = vector.broadcast %2 : vector<1x32xf32> to vector<256x32xf32>
    %4 = arith.mulf %1, %3 : vector<256x32xf32>
    %c0_4 = arith.constant 0 : index
    %c0_5 = arith.constant 0 : index
    %5 = vector.load %arg3[%c0_4, %c0_5] : memref<1x32xf32, #tpu.memory_space<vmem>>, vector<1x32xf32>
    %6 = vector.broadcast %5 : vector<1x32xf32> to vector<256x32xf32>
    %7 = arith.addf %4, %6 : vector<256x32xf32>
    %cst = arith.constant 0.000000e+00 : f32
    %8 = vector.broadcast %cst : f32 to vector<256x32xf32>
    %9 = arith.maximumf %7, %8 : vector<256x32xf32>
    %10 = arith.truncf %9 : vector<256x32xf32> to vector<256x32xbf16>
    %c0_6 = arith.constant 0 : index
    %c0_7 = arith.constant 0 : index
    %11 = vector.load %arg4[%c0_6, %c0_7] : memref<32x128xbf16, #tpu.memory_space<vmem>>, vector<32x128xbf16>
    %cst_8 = arith.constant dense<0.000000e+00> : vector<256x128xf32>
    %12 = tpu.matmul %10, %11, %cst_8 {dimension_numbers = #tpu.dot_dimension_numbers<[1], [0], [0], [1], [0, 0, 1, 1], [], []>} : vector<256x32xbf16>, vector<32x128xbf16>, vector<256x128xf32> -> vector<256x128xf32>
    %c0_9 = arith.constant 0 : index
    %c0_10 = arith.constant 0 : index
    %13 = vector.load %arg5[%c0_9, %c0_10] : memref<1x128xf32, #tpu.memory_space<vmem>>, vector<1x128xf32>
    %14 = vector.broadcast %13 : vector<1x128xf32> to vector<256x128xf32>
    %15 = arith.addf %12, %14 : vector<256x128xf32>
    %cst_11 = arith.constant 0.000000e+00 : f32
    %16 = vector.broadcast %cst_11 : f32 to vector<256x128xf32>
    %17 = arith.maximumf %15, %16 : vector<256x128xf32>
    %18 = arith.truncf %17 : vector<256x128xf32> to vector<256x128xbf16>
    %19 = vector.extract_strided_slice %18 {offsets = [0, 0], sizes = [32, 128], strides = [1, 1]} : vector<256x128xbf16> to vector<32x128xbf16>
    %c0_12 = arith.constant 0 : index
    %c0_13 = arith.constant 0 : index
    %20 = vector.load %arg8[%c0_12, %c0_13] : memref<32x1024xbf16, #tpu.memory_space<vmem>>, vector<32x128xbf16>
    tpu.vector_store %arg8[%c0_12, %c0_13], %19 {strides = array<i32>} : memref<32x1024xbf16, #tpu.memory_space<vmem>>, vector<32x128xbf16>,
    %21 = vector.extract_strided_slice %18 {offsets = [32, 0], sizes = [32, 128], strides = [1, 1]} : vector<256x128xbf16> to vector<32x128xbf16>
    %c0_14 = arith.constant 0 : index
    %c128 = arith.constant 128 : index
    %22 = vector.load %arg8[%c0_14, %c128] : memref<32x1024xbf16, #tpu.memory_space<vmem>>, vector<32x128xbf16>
    tpu.vector_store %arg8[%c0_14, %c128], %21 {strides = array<i32>} : memref<32x1024xbf16, #tpu.memory_space<vmem>>, vector<32x128xbf16>,
    %23 = vector.extract_strided_slice %18 {offsets = [64, 0], sizes = [32, 128], strides = [1, 1]} : vector<256x128xbf16> to vector<32x128xbf16>
    %c0_15 = arith.constant 0 : index
    %c256 = arith.constant 256 : index
    %24 = vector.load %arg8[%c0_15, %c256] : memref<32x1024xbf16, #tpu.memory_space<vmem>>, vector<32x128xbf16>
    tpu.vector_store %arg8[%c0_15, %c256], %23 {strides = array<i32>} : memref<32x1024xbf16, #tpu.memory_space<vmem>>, vector<32x128xbf16>,
    %25 = vector.extract_strided_slice %18 {offsets = [96, 0], sizes = [32, 128], strides = [1, 1]} : vector<256x128xbf16> to vector<32x128xbf16>
    %c0_16 = arith.constant 0 : index
    %c384 = arith.constant 384 : index
    %26 = vector.load %arg8[%c0_16, %c384] : memref<32x1024xbf16, #tpu.memory_space<vmem>>, vector<32x128xbf16>
    tpu.vector_store %arg8[%c0_16, %c384], %25 {strides = array<i32>} : memref<32x1024xbf16, #tpu.memory_space<vmem>>, vector<32x128xbf16>,
    %27 = vector.extract_strided_slice %18 {offsets = [128, 0], sizes = [32, 128], strides = [1, 1]} : vector<256x128xbf16> to vector<32x128xbf16>
    %c0_17 = arith.constant 0 : index
    %c512 = arith.constant 512 : index
    %28 = vector.load %arg8[%c0_17, %c512] : memref<32x1024xbf16, #tpu.memory_space<vmem>>, vector<32x128xbf16>
    tpu.vector_store %arg8[%c0_17, %c512], %27 {strides = array<i32>} : memref<32x1024xbf16, #tpu.memory_space<vmem>>, vector<32x128xbf16>,
    %29 = vector.extract_strided_slice %18 {offsets = [160, 0], sizes = [32, 128], strides = [1, 1]} : vector<256x128xbf16> to vector<32x128xbf16>
    %c0_18 = arith.constant 0 : index
    %c640 = arith.constant 640 : index
    %30 = vector.load %arg8[%c0_18, %c640] : memref<32x1024xbf16, #tpu.memory_space<vmem>>, vector<32x128xbf16>
    tpu.vector_store %arg8[%c0_18, %c640], %29 {strides = array<i32>} : memref<32x1024xbf16, #tpu.memory_space<vmem>>, vector<32x128xbf16>,
    %31 = vector.extract_strided_slice %18 {offsets = [192, 0], sizes = [32, 128], strides = [1, 1]} : vector<256x128xbf16> to vector<32x128xbf16>
    %c0_19 = arith.constant 0 : index
    %c768 = arith.constant 768 : index
    %32 = vector.load %arg8[%c0_19, %c768] : memref<32x1024xbf16, #tpu.memory_space<vmem>>, vector<32x128xbf16>
    tpu.vector_store %arg8[%c0_19, %c768], %31 {strides = array<i32>} : memref<32x1024xbf16, #tpu.memory_space<vmem>>, vector<32x128xbf16>,
    %33 = vector.extract_strided_slice %18 {offsets = [224, 0], sizes = [32, 128], strides = [1, 1]} : vector<256x128xbf16> to vector<32x128xbf16>
    %c0_20 = arith.constant 0 : index
    %c896 = arith.constant 896 : index
    %34 = vector.load %arg8[%c0_20, %c896] : memref<32x1024xbf16, #tpu.memory_space<vmem>>, vector<32x128xbf16>
    tpu.vector_store %arg8[%c0_20, %c896], %33 {strides = array<i32>} : memref<32x1024xbf16, #tpu.memory_space<vmem>>, vector<32x128xbf16>,
    %c0_21 = arith.constant 0 : index
    %c0_22 = arith.constant 0 : index
    %35 = vector.load %arg8[%c0_21, %c0_22] : memref<32x1024xbf16, #tpu.memory_space<vmem>>, vector<32x1024xbf16>
    %c0_23 = arith.constant 0 : index
    %c0_24 = arith.constant 0 : index
    %36 = vector.load %arg6[%c0_23, %c0_24] : memref<1024x128xbf16, #tpu.memory_space<vmem>>, vector<1024x128xbf16>
    %cst_25 = arith.constant dense<0.000000e+00> : vector<32x128xf32>
    %37 = tpu.matmul %35, %36, %cst_25 {dimension_numbers = #tpu.dot_dimension_numbers<[1], [0], [0], [1], [0, 0, 1, 1], [], []>} : vector<32x1024xbf16>, vector<1024x128xbf16>, vector<32x128xf32> -> vector<32x128xf32>
    %c0_26 = arith.constant 0 : index
    %c0_27 = arith.constant 0 : index
    %38 = vector.load %arg7[%c0_26, %c0_27] : memref<32x128xf32, #tpu.memory_space<vmem>>, vector<32x128xf32>
    tpu.vector_store %arg7[%c0_26, %c0_27], %37 {strides = array<i32>} : memref<32x128xf32, #tpu.memory_space<vmem>>, vector<32x128xf32>,
    return
  }
  func.func @transform_0(%arg0: i32) -> (i32, i32, i32) {
    %c0_i32 = arith.constant 0 : i32
    %c0_i32_0 = arith.constant 0 : i32
    %c0_i32_1 = arith.constant 0 : i32
    return %c0_i32, %arg0, %c0_i32_0 : i32, i32, i32
  }
  func.func @transform_1(%arg0: i32) -> (i32, i32) {
    %c0_i32 = arith.constant 0 : i32
    %c0_i32_0 = arith.constant 0 : i32
    %c0_i32_1 = arith.constant 0 : i32
    return %c0_i32, %c0_i32_0 : i32, i32
  }
  func.func @transform_2(%arg0: i32) -> (i32, i32) {
    %c0_i32 = arith.constant 0 : i32
    %c0_i32_0 = arith.constant 0 : i32
    %c0_i32_1 = arith.constant 0 : i32
    return %c0_i32, %c0_i32_0 : i32, i32
  }
  func.func @transform_3(%arg0: i32) -> (i32, i32) {
    %c0_i32 = arith.constant 0 : i32
    %c0_i32_0 = arith.constant 0 : i32
    %c0_i32_1 = arith.constant 0 : i32
    return %c0_i32, %c0_i32_0 : i32, i32
  }
  func.func @transform_4(%arg0: i32) -> (i32, i32) {
    %c0_i32 = arith.constant 0 : i32
    %c0_i32_0 = arith.constant 0 : i32
    %c0_i32_1 = arith.constant 0 : i32
    return %c0_i32, %c0_i32_0 : i32, i32
  }
  func.func @transform_5(%arg0: i32) -> (i32, i32) {
    %c0_i32 = arith.constant 0 : i32
    %c0_i32_0 = arith.constant 0 : i32
    %c0_i32_1 = arith.constant 0 : i32
    return %c0_i32, %c0_i32_0 : i32, i32
  }
  func.func @transform_6(%arg0: i32) -> (i32, i32) {
    %c0_i32 = arith.constant 0 : i32
    %c0_i32_0 = arith.constant 0 : i32
    return %arg0, %c0_i32 : i32, i32
  }
}

</mosaic_0001>

<bundles_post_ra>
// kernel: _forward.1
= control target key start
LH: loop header
LB: loop body
LE: loop exit
PB: predicated region body
PF: predicated region fallthrough
CT: control target
= control target key end

     0   :  { %11 = vsyncpa [#allocation5], 0  ;;  %s2707_s0 = inlined_call_operand.vmem [shape: f32[8,128,32], index: 0, kind: input, shape index: {}]   ;;  %s2708_s1 = inlined_call_operand.vmem [shape: f32[1,32], index: 1, kind: input, shape index: {}]   ;;  %s2709_s2 = inlined_call_operand.vmem [shape: f32[1,32], index: 2, kind: input, shape index: {}]   ;;  %s2710_s3 = inlined_call_operand.vmem [shape: bf16[32,128], index: 3, kind: input, shape index: {}]   ;;  %s2711_s4 = inlined_call_operand.vmem [shape: f32[1,128], index: 4, kind: input, shape index: {}]   ;;  %s2712_s5 = inlined_call_operand.vmem [shape: bf16[1024,128], index: 5, kind: input, shape index: {}]   ;;  %s2713_s6 = inlined_call_operand.hbm [shape: f32[128,128], index: 6, kind: output, shape index: {}]  }
   0x1   :  { %13 = vsyncpa [#allocation5 + $0x1], 0  ;;  %s2153_s21 = smov 0   ;;  %s2155_s22 = smov 0  }
   0x2   :  { %s2157_s23 = smov 0   ;;  %s2159_s24 = smov 0  }
   0x3 LB: > { %s1676_s25 = sadd.s32 4294967295, %s2113_s24   ;;  %s1677_s26 = sadd.s32 4294967294, %s2113_s24   ;;  %s2113_s24 = sphi %s2159_s24, %s2719_s24   ;;  %s2109_s23 = sphi %s2157_s23, %s2718_s23   ;;  %s2105_s22 = sphi %s2155_s22, %s2717_s22   ;;  %s2101_s21 = sphi %s2153_s21, %s2716_s21  }
   0x4   : > { %s2176_s27 = sadd.s32 1, %s2113_s24   ;;  %s26_s28 = sadd.s32 1, %s2109_s23 }
   0x5   : > { %s23_s29 = ssub.s32 %s2113_s24, %s2176_s27  ;;  %p33_p0 = scmp.ne.s32.totalorder %s2109_s23, %s2105_s22 }
   0x6   : > { %p24_p1 = scmp.eq.s32.totalorder %s23_s29, 0  ;;  %p34_p2 = scmp.eq.s32.totalorder %s2113_s24, 0 }
   0x7   : > { %p168_p3 = scmp.eq.s32.totalorder %s1676_s25, 3  ;;  %p173_p4 = scmp.ne.s32.totalorder %s2105_s22, %s2101_s21 }
   0x8   : > { %s2189_s30 = scalar_select %p24_p1, %s2109_s23, %s26_s28  }
   0x9   : > { %p35_p5 = por %p34_p2, %p33_p0  ;;  %p2191_p6 = por %p168_p3, %p33_p0 }
   0xa   : > { %p174_p7 = scmp.eq.s32.totalorder %s1677_s26, 3  ;;  %p1679_p9 = scmp.ge.s32.totalorder %s2113_s24, 4 }
   0xc   : > { %p2195_p8 = por %p174_p7, %p173_p4  ;;  %205 = sbr.rel (%p1679_p9) target bundleno = 39 (0x27), region = 36 }
  0x13   : > { %208 = sbr.rel (!%p35_p5) target bundleno = 39 (0x27), region = 40  ;;  %s210_s9 = sand.u32 (%p35_p5), 1, %s2109_s23  }
  0x14   : > { %s1776_s10 = sshll.u32 (%p35_p5), %s2113_s24, 5  ;;  %s1680_s11 = sshll.u32 (%p35_p5), %s210_s9, 8 }
  0x15   : > { %s2205_s14 = scalar_lea.vmem (%p35_p5), %s2707_s0, %s1776_s10  ;;  %s2210_s15 = scalar_lea.vmem (%p35_p5), [#allocation3], %s1680_s11 }
  0x16   : > { %v305_v0 = vld [vmem:[%s2205_s14] sm:$0xff] (%p35_p5)  ;;  %v307_v1 = vld [vmem:[%s2205_s14 + $0x8] sm:$0xff] (%p35_p5)  ;;  %v309_v2 = vld [vmem:[%s2205_s14 + $0x10] sm:$0xff] (%p35_p5) }
  0x17   : > { %306 = vst [vmem:[%s2210_s15] sm:$0xff] (%p35_p5), %v305_v0  ;;  %308 = vst [vmem:[%s2210_s15 + $0x8] sm:$0xff] (%p35_p5), %v307_v1  ;;  %v311_v3 = vld [vmem:[%s2205_s14 + $0x18] sm:$0xff] (%p35_p5)  ;;  %v313_v4 = vld [vmem:[%s2205_s14 + $0x80] sm:$0xff] (%p35_p5) }
  0x18   : > { %310 = vst [vmem:[%s2210_s15 + $0x10] sm:$0xff] (%p35_p5), %v309_v2  ;;  %v315_v5 = vld [vmem:[%s2205_s14 + $0x88] sm:$0xff] (%p35_p5)  ;;  %312 = vst [vmem:[%s2210_s15 + $0x18] sm:$0xff] (%p35_p5), %v311_v3  ;;  %v317_v6 = vld [vmem:[%s2205_s14 + $0x90] sm:$0xff] (%p35_p5) }
  0x19   : > { %314 = vst [vmem:[%s2210_s15 + $0x20] sm:$0xff] (%p35_p5), %v313_v4  ;;  %316 = vst [vmem:[%s2210_s15 + $0x28] sm:$0xff] (%p35_p5), %v315_v5  ;;  %v319_v7 = vld [vmem:[%s2205_s14 + $0x98] sm:$0xff] (%p35_p5)  ;;  %v321_v8 = vld [vmem:[%s2205_s14 + $0x100] sm:$0xff] (%p35_p5) }
  0x1a   : > { %318 = vst [vmem:[%s2210_s15 + $0x30] sm:$0xff] %v317_v6  ;;  %320 = vst [vmem:[%s2210_s15 + $0x38] sm:$0xff] %v319_v7  ;;  %v323_v9 = vld [vmem:[%s2205_s14 + $0x108] sm:$0xff]  ;;  %v325_v10 = vld [vmem:[%s2205_s14 + $0x110] sm:$0xff] }
  0x1b   : > { %322 = vst [vmem:[%s2210_s15 + $0x40] sm:$0xff] %v321_v8  ;;  %v327_v11 = vld [vmem:[%s2205_s14 + $0x118] sm:$0xff]  ;;  %324 = vst [vmem:[%s2210_s15 + $0x48] sm:$0xff] %v323_v9  ;;  %v329_v12 = vld [vmem:[%s2205_s14 + $0x180] sm:$0xff] }
  0x1c   : > { %326 = vst [vmem:[%s2210_s15 + $0x50] sm:$0xff] %v325_v10  ;;  %328 = vst [vmem:[%s2210_s15 + $0x58] sm:$0xff] %v327_v11  ;;  %v331_v13 = vld [vmem:[%s2205_s14 + $0x188] sm:$0xff]  ;;  %v333_v14 = vld [vmem:[%s2205_s14 + $0x190] sm:$0xff] }
  0x1d   : > { %330 = vst [vmem:[%s2210_s15 + $0x60] sm:$0xff] %v329_v12  ;;  %332 = vst [vmem:[%s2210_s15 + $0x68] sm:$0xff] %v331_v13  ;;  %v335_v15 = vld [vmem:[%s2205_s14 + $0x198] sm:$0xff]  ;;  %v337_v16 = vld [vmem:[%s2205_s14 + $0x200] sm:$0xff] }
  0x1e   : > { %334 = vst [vmem:[%s2210_s15 + $0x70] sm:$0xff] %v333_v14  ;;  %v339_v17 = vld [vmem:[%s2205_s14 + $0x208] sm:$0xff]  ;;  %336 = vst [vmem:[%s2210_s15 + $0x78] sm:$0xff] %v335_v15  ;;  %v341_v18 = vld [vmem:[%s2205_s14 + $0x210] sm:$0xff] }
  0x1f   : > { %338 = vst [vmem:[%s2210_s15 + $0x80] sm:$0xff] %v337_v16  ;;  %340 = vst [vmem:[%s2210_s15 + $0x88] sm:$0xff] %v339_v17  ;;  %v343_v19 = vld [vmem:[%s2205_s14 + $0x218] sm:$0xff]  ;;  %v345_v20 = vld [vmem:[%s2205_s14 + $0x280] sm:$0xff] }
  0x20   : > { %342 = vst [vmem:[%s2210_s15 + $0x90] sm:$0xff] %v341_v18  ;;  %344 = vst [vmem:[%s2210_s15 + $0x98] sm:$0xff] %v343_v19  ;;  %v347_v21 = vld [vmem:[%s2205_s14 + $0x288] sm:$0xff]  ;;  %v349_v22 = vld [vmem:[%s2205_s14 + $0x290] sm:$0xff] }
  0x21   : > { %346 = vst [vmem:[%s2210_s15 + $0xa0] sm:$0xff] %v345_v20  ;;  %v351_v23 = vld [vmem:[%s2205_s14 + $0x298] sm:$0xff]  ;;  %348 = vst [vmem:[%s2210_s15 + $0xa8] sm:$0xff] %v347_v21  ;;  %v353_v24 = vld [vmem:[%s2205_s14 + $0x300] sm:$0xff] }
  0x22   : > { %350 = vst [vmem:[%s2210_s15 + $0xb0] sm:$0xff] %v349_v22  ;;  %352 = vst [vmem:[%s2210_s15 + $0xb8] sm:$0xff] %v351_v23  ;;  %v355_v25 = vld [vmem:[%s2205_s14 + $0x308] sm:$0xff]  ;;  %v357_v26 = vld [vmem:[%s2205_s14 + $0x310] sm:$0xff] }
  0x23   : > { %354 = vst [vmem:[%s2210_s15 + $0xc0] sm:$0xff] %v353_v24  ;;  %356 = vst [vmem:[%s2210_s15 + $0xc8] sm:$0xff] %v355_v25  ;;  %v359_v27 = vld [vmem:[%s2205_s14 + $0x318] sm:$0xff]  ;;  %v361_v28 = vld [vmem:[%s2205_s14 + $0x380] sm:$0xff] }
  0x24   : > { %358 = vst [vmem:[%s2210_s15 + $0xd0] sm:$0xff] %v357_v26  ;;  %v363_v29 = vld [vmem:[%s2205_s14 + $0x388] sm:$0xff]  ;;  %360 = vst [vmem:[%s2210_s15 + $0xd8] sm:$0xff] %v359_v27  ;;  %v365_v30 = vld [vmem:[%s2205_s14 + $0x390] sm:$0xff] }
  0x25   : > { %362 = vst [vmem:[%s2210_s15 + $0xe0] sm:$0xff] %v361_v28  ;;  %364 = vst [vmem:[%s2210_s15 + $0xe8] sm:$0xff] %v363_v29  ;;  %v367_v31 = vld [vmem:[%s2205_s14 + $0x398] sm:$0xff] }
  0x26   : > { %366 = vst [vmem:[%s2210_s15 + $0xf0] sm:$0xff] %v365_v30  ;;  %368 = vst [vmem:[%s2210_s15 + $0xf8] sm:$0xff] %v367_v31 }
  0x27 PF: > { %p1683_p10 = scmp.ge.s32.totalorder %s2113_s24, 1  ;;  %p373_p11 = scmp.lt.s32.totalorder %s2113_s24, 5 }
  0x29   : > { %p374_p12 = pnand %p1683_p10, %p373_p11 }
  0x2a   : > { %v1985_v32 = vld [vmem:[%s2710_s3] sm:$0xff] (!%p374_p12)   ;;  %s2279_s18 = sand.u32 (!%p374_p12), 1, %s2105_s22   ;;  %v1986_v33 = vld [vmem:[%s2710_s3 + $0x8] sm:$0xff] (!%p374_p12)   ;;  %vm593_vm0 = vcmask (!%p374_p12), 261120   ;;  %s1777_s20 = sshll.u32 (!%p374_p12), %s1676_s25, 9 }
  0x2b   : > { %377 = sbr.rel (%p374_p12) target bundleno = 591 (0x24f), region = 78  ;;  %s1684_s26 = sshll.u32 (!%p374_p12), %s2279_s18, 8  ;;  %1908 = vmatprep.subr.bf16.mxu0 (!%p374_p12), %v1985_v32  ;;  %v2288_v34 = vld [vmem:[%s2708_s1] ss:$0 sm:$0xff] (!%p374_p12) }
  0x2c   : > { %v2293_v35 = vld [vmem:[%s2709_s2] ss:$0 sm:$0xff] (!%p374_p12)  ;;  %1909 = vmatpush3.bf16.msra.mxu0 (!%p374_p12), %v1985_v32  ;;  %s2295_s11 = scalar_lea.vmem (!%p374_p12), [#allocation3], %s1684_s26  ;;  %s1685_s16 = sshll.u32 (!%p374_p12), %s2279_s18, 5 }
  0x2d   : > { %v412_v36 = vld [vmem:[%s2295_s11] sm:$0xff] (!%p374_p12)  ;;  %v413_v37 = vld [vmem:[%s2295_s11 + $0x8] sm:$0xff] (!%p374_p12)  ;;  %v414_v38 = vld [vmem:[%s2295_s11 + $0x10] sm:$0xff] (!%p374_p12)  ;;  %1910 = vmatprep.subr.bf16.mxu0 (!%p374_p12), %v1986_v33  ;;  %s408_s17 = scalar_lea.vmem (!%p374_p12), [#allocation4], %s1685_s16  ;;  %s2664_s29 = scalar_lea.hbm (!%p374_p12), %s2713_s6, %s1777_s20 }
  0x2e   : > { %v451_v39 = vmul.f32 (!%p374_p12), %v2288_v34, %v412_v36  ;;  %v452_v40 = vmul.f32 (!%p374_p12), %v2288_v34, %v413_v37  ;;  %v415_v41 = vld [vmem:[%s2295_s11 + $0x18] sm:$0xff] (!%p374_p12)  ;;  %v453_v42 = vmul.f32 (!%p374_p12), %v2288_v34, %v414_v38  ;;  %v416_v43 = vld [vmem:[%s2295_s11 + $0x20] sm:$0xff] (!%p374_p12)  ;;  %v417_v44 = vld [vmem:[%s2295_s11 + $0x28] sm:$0xff] (!%p374_p12)  ;;  %s1609_s19 = sshll.u32 (!%p374_p12), %s408_s17, 4  ;;  %s1596_s9 = scalar_lea.sflag (!%p374_p12), [#allocation5], %s2279_s18  ;;  %s2659_s19 = int_to_ptr.vmem [resolvable:$true] %s1609_s19 }
  0x2f   : > { %v454_v45 = vmul.f32 (!%p374_p12), %v2288_v34, %v415_v41  ;;  %v455_v46 = vmul.f32 (!%p374_p12), %v2288_v34, %v416_v43  ;;  %v456_v47 = vmul.f32 (!%p374_p12), %v2288_v34, %v417_v44  ;;  %v418_v48 = vld [vmem:[%s2295_s11 + $0x30] sm:$0xff] (!%p374_p12)  ;;  %v419_v49 = vld [vmem:[%s2295_s11 + $0x38] sm:$0xff] (!%p374_p12)  ;;  %v420_v58 = vld [vmem:[%s2295_s11 + $0x40] sm:$0xff] (!%p374_p12)  ;;  %s2051_s10 = scalar_lea.vmem (!%p374_p12), %s2659_s19, 512  ;;  %s2115_s25 = smov (!%p374_p12), [#allocation4]  }
  0x30   : > { %v490_v50 = vadd.f32 (!%p374_p12), %v2293_v35, %v451_v39  ;;  %v491_v51 = vadd.f32 (!%p374_p12), %v2293_v35, %v452_v40  ;;  %v492_v52 = vadd.f32 (!%p374_p12), %v2293_v35, %v453_v42  ;;  %v457_v53 = vmul.f32 (!%p374_p12), %v2288_v34, %v418_v48  ;;  %1911 = vmatpush3.bf16.msra.mxu0 (!%p374_p12), %v1986_v33  ;;  %v421_v59 = vld [vmem:[%s2295_s11 + $0x48] sm:$0xff] (!%p374_p12)  ;;  %v422_v0 = vld [vmem:[%s2295_s11 + $0x50] sm:$0xff] (!%p374_p12)  ;;  %v423_v5 = vld [vmem:[%s2295_s11 + $0x58] sm:$0xff] (!%p374_p12)  ;;  %p2052_p13 = scmp.ne.s32.totalorder (!%p374_p12), %s2659_s19, %s2051_s10  ;;  %s2055_s12 = sshll.u32 (!%p374_p12), %s2115_s25, 4  ;;  %s2056_s12 = int_to_ptr.vmem [resolvable:$false] %s2055_s12 }
  0x31   : > { %v493_v54 = vadd.f32 (!%p374_p12), %v2293_v35, %v454_v45  ;;  %v494_v55 = vadd.f32 (!%p374_p12), %v2293_v35, %v455_v46  ;;  %v495_v56 = vadd.f32 (!%p374_p12), %v2293_v35, %v456_v47  ;;  %v458_v57 = vmul.f32 (!%p374_p12), %v2288_v34, %v419_v49  ;;  %v424_v6 = vld [vmem:[%s2295_s11 + $0x60] sm:$0xff] (!%p374_p12)  ;;  %v425_v10 = vld [vmem:[%s2295_s11 + $0x68] sm:$0xff] (!%p374_p12)  ;;  %v426_v11 = vld [vmem:[%s2295_s11 + $0x70] sm:$0xff] (!%p374_p12)  ;;  %s2057_s13 = scalar_lea.vmem (!%p374_p12), %s2056_s12, 1024  ;;  %p2058_p2 = scmp.lt.s32.totalorder (!%p374_p12), %s2659_s19, %s2056_s12 }
  0x32   : > { %v522_v60 = vmax.f32 %v490_v50, 0.0  ;;  %v523_v61 = vmax.f32 %v491_v51, 0.0  ;;  %v524_v62 = vmax.f32 %v492_v52, 0.0  ;;  %v496_v63 = vadd.f32 %v2293_v35, %v457_v53  ;;  %v427_v20 = vld [vmem:[%s2295_s11 + $0x78] sm:$0xff]  ;;  %v428_v21 = vld [vmem:[%s2295_s11 + $0x80] sm:$0xff]  ;;  %v429_v26 = vld [vmem:[%s2295_s11 + $0x88] sm:$0xff]  ;;  %p2053_p0 = pnand %p2052_p13, %p2191_p6  ;;  %p2059_p3 = scmp.lt.s32.totalorder %s2057_s13, %s2051_s10 }
  0x33   : > { %v525_v1 = vmax.f32 %v493_v54, 0.0  ;;  %v526_v2 = vmax.f32 %v494_v55, 0.0  ;;  %v527_v3 = vmax.f32 %v495_v56, 0.0  ;;  %v497_v4 = vadd.f32 %v2293_v35, %v458_v57  ;;  %v430_v27 = vld [vmem:[%s2295_s11 + $0x90] sm:$0xff]  ;;  %v431_v32 = vld [vmem:[%s2295_s11 + $0x98] sm:$0xff]  ;;  %v1987_v33 = vld [vmem:[%s2712_s5 + $0x40] sm:$0xff]  }
  0x34   : > { %v554_v7 = vpack.c.bf16 %v523_v61, %v522_v60  ;;  %v459_v8 = vmul.f32 %v2288_v34, %v420_v58  ;;  %v460_v9 = vmul.f32 %v2288_v34, %v421_v59  ;;  %v528_v14 = vmax.f32 %v496_v63, 0.0  ;;  %v1988_v36 = vld [vmem:[%s2712_s5] sm:$0xff]   ;;  %v433_v40 = vld [vmem:[%s2295_s11 + $0xa8] sm:$0xff]  ;;  %v434_v44 = vld [vmem:[%s2295_s11 + $0xb0] sm:$0xff]  ;;  %1796 = vmatprep.subr.bf16.mxu1 %v1987_v33  ;;  %p2054_p1 = pneg %p2053_p0  ;;  %p2060_p4 = por %p2059_p3, %p2058_p2 }
  0x35   : > { %v555_v12 = vpack.c.bf16 %v525_v1, %v524_v62  ;;  %v556_v13 = vpack.c.bf16 %v527_v3, %v526_v2  ;;  %v461_v15 = vmul.f32 %v2288_v34, %v422_v0  ;;  %v462_v18 = vmul.f32 %v2288_v34, %v423_v5  ;;  %v432_v39 = vld [vmem:[%s2295_s11 + $0xa0] sm:$0xff]  ;;  %v1989_v41 = vld [vmem:[%s2712_s5 + $0x48] sm:$0xff]   ;;  %v435_v49 = vld [vmem:[%s2295_s11 + $0xb8] sm:$0xff]  ;;  %1797 = vmatpush3.bf16.msra.mxu1 %v1988_v36 }
  0x36   : > { %1912 = vmatprep.mubr.msk.bf16.mxu0 %vm593_vm0, %v554_v7  ;;  %v498_v16 = vadd.f32 %v2293_v35, %v459_v8  ;;  %v499_v17 = vadd.f32 %v2293_v35, %v460_v9  ;;  %v463_v19 = vmul.f32 %v2288_v34, %v424_v6  ;;  %v529_v22 = vmax.f32 %v497_v4, 0.0  ;;  %v436_v54 = vld [vmem:[%s2295_s11 + $0xc0] sm:$0xff]  ;;  %1798 = vmatprep.subr.bf16.mxu1 %v1989_v41  ;;  %v1990_v55 = vld [vmem:[%s2712_s5 + $0x8] sm:$0xff]   ;;  %v1991_v60 = vld [vmem:[%s2712_s5 + $0x50] sm:$0xff]   ;;  %p2061_p5 = pnand %p2060_p4, %p2054_p1 }
  0x37   : > { %1913 = vmatmul.mubr.msk.bf16.vlgmr.msra.gmra.mrb[0].mxu0 %vm593_vm0, %v555_v12  ;;  %v500_v23 = vadd.f32 %v2293_v35, %v461_v15  ;;  %v464_v24 = vmul.f32 %v2288_v34, %v425_v10  ;;  %v465_v25 = vmul.f32 %v2288_v34, %v426_v11  ;;  %v501_v30 = vadd.f32 %v2293_v35, %v462_v18  ;;  %v437_v59 = vld [vmem:[%s2295_s11 + $0xc8] sm:$0xff]  ;;  %v438_v0 = vld [vmem:[%s2295_s11 + $0xd0] sm:$0xff]  ;;  %v439_v1 = vld [vmem:[%s2295_s11 + $0xd8] sm:$0xff] }
  0x38   : > { %1916 = vmatprep.mubr.msk.bf16.mxu0 %vm593_vm0, %v556_v13  ;;  %v530_v28 = vmax.f32 %v498_v16, 0.0  ;;  %v531_v29 = vmax.f32 %v499_v17, 0.0  ;;  %v502_v31 = vadd.f32 %v2293_v35, %v463_v19  ;;  %v466_v38 = vmul.f32 %v2288_v34, %v427_v20  ;;  %v440_v4 = vld [vmem:[%s2295_s11 + $0xe0] sm:$0xff]  ;;  %v1992_v5 = vld [vmem:[%s2712_s5 + $0x10] sm:$0xff]   ;;  %v441_v10 = vld [vmem:[%s2295_s11 + $0xe8] sm:$0xff] }
  0x39   : > { %v503_v37 = vadd.f32 %v2293_v35, %v464_v24  ;;  %v532_v42 = vmax.f32 %v500_v23, 0.0  ;;  %v467_v43 = vmul.f32 %v2288_v34, %v428_v21  ;;  %v557_v45 = vpack.c.bf16 %v529_v22, %v528_v14  ;;  %1799 = vmatpush3.bf16.msra.mxu1 %v1990_v55  ;;  %v1993_v11 = vld [vmem:[%s2712_s5 + $0x58] sm:$0xff]   ;;  %v442_v20 = vld [vmem:[%s2295_s11 + $0xf0] sm:$0xff] }
  0x3a   : > { %v533_v46 = vmax.f32 %v501_v30, 0.0  ;;  %v534_v47 = vmax.f32 %v502_v31, 0.0  ;;  %v468_v48 = vmul.f32 %v2288_v34, %v429_v26  ;;  %v558_v50 = vpack.c.bf16 %v531_v29, %v530_v28  ;;  %1800 = vmatprep.subr.bf16.mxu1 %v1991_v60  ;;  %v443_v30 = vld [vmem:[%s2295_s11 + $0xf8] sm:$0xff] }
  0x3b   : > { %v535_v51 = vmax.f32 %v503_v37, 0.0  ;;  %v2366_v52 = vadd.f32 %v2293_v35, %v465_v25  ;;  %v469_v53 = vmul.f32 %v2288_v34, %v430_v27  ;;  %v2374_v56 = vadd.f32 %v2293_v35, %v466_v38  ;;  %v1994_v25 = vld [vmem:[%s2712_s5 + $0x18] sm:$0xff]  }
  0x3c   : > { %v2377_v57 = vadd.f32 %v2293_v35, %v467_v43  ;;  %v470_v58 = vmul.f32 %v2288_v34, %v431_v32  ;;  %v2385_v61 = vadd.f32 %v2293_v35, %v468_v48  ;;  %v471_v62 = vmul.f32 %v2288_v34, %v432_v39 }
  0x3d   : > { %v472_v63 = vmul.f32 %v2288_v34, %v433_v40  ;;  %v559_v2 = vpack.c.bf16 %v533_v46, %v532_v42  ;;  %v473_v3 = vmul.f32 %v2288_v34, %v434_v44  ;;  %v560_v6 = vpack.c.bf16 %v535_v51, %v534_v47  ;;  %1801 = vmatpush3.bf16.msra.mxu1 %v1992_v5  ;;  %v2002_v5 = vld [vmem:[%s2712_s5 + $0x38] sm:$0xff]  }
  0x3e   : > { %v536_v7 = vmax.f32 %v2366_v52, 0.0  ;;  %v508_v8 = vadd.f32 %v2293_v35, %v469_v53  ;;  %v474_v9 = vmul.f32 %v2288_v34, %v435_v49  ;;  %v537_v12 = vmax.f32 %v2374_v56, 0.0  ;;  %1802 = vmatprep.subr.bf16.mxu1 %v1993_v11  ;;  %v2013_v11 = vld [vmem:[%s2712_s5 + $0x150] sm:$0xff]  }
  0x3f   : > { %1917 = vmatmul.mubr.msk.bf16.gmra.mrb[4].mxu0 %vm593_vm0, %v557_v45  ;;  %v538_v13 = vmax.f32 %v2377_v57, 0.0  ;;  %v509_v14 = vadd.f32 %v2293_v35, %v470_v58  ;;  %v475_v15 = vmul.f32 %v2288_v34, %v436_v54  ;;  %v539_v16 = vmax.f32 %v2385_v61, 0.0 }
  0x40   : > { %1920 = vmatprep.mubr.msk.bf16.mxu0 %vm593_vm0, %v558_v50  ;;  %v510_v17 = vadd.f32 %v2293_v35, %v471_v62  ;;  %v511_v18 = vadd.f32 %v2293_v35, %v472_v63  ;;  %v476_v19 = vmul.f32 %v2288_v34, %v437_v59  ;;  %v512_v21 = vadd.f32 %v2293_v35, %v473_v3  ;;  %v1995_v62 = vld [vmem:[%s2712_s5 + $0x60] sm:$0xff]   ;;  %v2000_v3 = vld [vmem:[%s2712_s5 + $0x30] sm:$0xff]  }
  0x41   : > { %v513_v22 = vadd.f32 %v2293_v35, %v474_v9  ;;  %v477_v23 = vmul.f32 %v2288_v34, %v438_v0  ;;  %v478_v24 = vmul.f32 %v2288_v34, %v439_v1  ;;  %v540_v26 = vmax.f32 %v508_v8, 0.0  ;;  %1803 = vmatpush3.bf16.msra.mxu1 %v1994_v25  ;;  %v1996_v63 = vld [vmem:[%s2712_s5 + $0x20] sm:$0xff]   ;;  %v1997_v0 = vld [vmem:[%s2712_s5 + $0x68] sm:$0xff]  }
  0x42   : > { %v514_v27 = vadd.f32 %v2293_v35, %v475_v15  ;;  %v515_v28 = vadd.f32 %v2293_v35, %v476_v19  ;;  %v479_v29 = vmul.f32 %v2288_v34, %v440_v4  ;;  %v541_v31 = vmax.f32 %v509_v14, 0.0  ;;  %1804 = vmatprep.subr.bf16.mxu1 %v1995_v62  ;;  %v1998_v1 = vld [vmem:[%s2712_s5 + $0x28] sm:$0xff]   ;;  %v2001_v4 = vld [vmem:[%s2712_s5 + $0x78] sm:$0xff]   ;;  %v2005_v8 = vld [vmem:[%s2712_s5 + $0xc0] sm:$0xff]  }
  0x43   : > { %v516_v32 = vadd.f32 %v2293_v35, %v477_v23  ;;  %v517_v33 = vadd.f32 %v2293_v35, %v478_v24  ;;  %v480_v36 = vmul.f32 %v2288_v34, %v441_v10  ;;  %v542_v37 = vmax.f32 %v510_v17, 0.0  ;;  %v2009_v9 = vld [vmem:[%s2712_s5 + $0x148] sm:$0xff]   ;;  %v2018_v14 = vld [vmem:[%s2712_s5 + $0x118] sm:$0xff]   ;;  %v2021_v15 = vld [vmem:[%s2712_s5 + $0x160] sm:$0xff]  }
  0x44   : > { %v543_v38 = vmax.f32 %v511_v18, 0.0  ;;  %v518_v39 = vadd.f32 %v2293_v35, %v479_v29  ;;  %v481_v40 = vmul.f32 %v2288_v34, %v442_v20  ;;  %v544_v41 = vmax.f32 %v512_v21, 0.0  ;;  %v2010_v10 = vld [vmem:[%s2712_s5 + $0x108] sm:$0xff]   ;;  %v2029_v19 = vld [vmem:[%s2712_s5 + $0x170] sm:$0xff]   ;;  %v2033_v21 = vld [vmem:[%s2712_s5 + $0x178] sm:$0xff]  }
  0x45   : > { %v545_v42 = vmax.f32 %v513_v22, 0.0  ;;  %v519_v43 = vadd.f32 %v2293_v35, %v480_v36  ;;  %v482_v44 = vmul.f32 %v2288_v34, %v443_v30  ;;  %v546_v45 = vmax.f32 %v514_v27, 0.0  ;;  %1805 = vmatpush3.bf16.msra.mxu1 %v1996_v63  ;;  %v2025_v17 = vld [vmem:[%s2712_s5 + $0x168] sm:$0xff]   ;;  %v2030_v20 = vld [vmem:[%s2712_s5 + $0x130] sm:$0xff]   ;;  %v2034_v22 = vld [vmem:[%s2712_s5 + $0x138] sm:$0xff]  }
  0x46   : > { %v547_v46 = vmax.f32 %v515_v28, 0.0  ;;  %v520_v47 = vadd.f32 %v2293_v35, %v481_v40  ;;  %v548_v48 = vmax.f32 %v516_v32, 0.0  ;;  %v549_v49 = vmax.f32 %v517_v33, 0.0  ;;  %1806 = vmatprep.subr.bf16.mxu1 %v1997_v0  ;;  %v2026_v18 = vld [vmem:[%s2712_s5 + $0x128] sm:$0xff]   ;;  %v2523_v23 = vld [vmem:[%s2711_s4] ss:$0 sm:$0xff] }
  0x47   : > { %1921 = vmatmul.mubr.msk.bf16.gmra.mrb[8].mxu0 %vm593_vm0, %v559_v2  ;;  %v521_v50 = vadd.f32 %v2293_v35, %v482_v44  ;;  %v550_v51 = vmax.f32 %v518_v39, 0.0  ;;  %v551_v52 = vmax.f32 %v519_v43, 0.0  ;;  %v561_v53 = vpack.c.bf16 %v537_v12, %v536_v7  ;;  %v1999_v2 = vld [vmem:[%s2712_s5 + $0x70] sm:$0xff]   ;;  %v2004_v7 = vld [vmem:[%s2712_s5 + $0x100] sm:$0xff]   ;;  %v2008_v62 = vld [vmem:[%s2712_s5 + $0x88] sm:$0xff]  }
  0x48   : > { %1924 = vmatprep.mubr.msk.bf16.mxu0 %vm593_vm0, %v560_v6  ;;  %v552_v54 = vmax.f32 %v520_v47, 0.0  ;;  %v562_v56 = vpack.c.bf16 %v539_v16, %v538_v13  ;;  %v563_v34 = vpack.c.bf16 %v541_v31, %v540_v26  ;;  %v564_v57 = vpack.c.bf16 %v543_v38, %v542_v37  ;;  %v2003_v6 = vld [vmem:[%s2712_s5 + $0x140] sm:$0xff]   ;;  %v2014_v12 = vld [vmem:[%s2712_s5 + $0x110] sm:$0xff]   ;;  %v2017_v13 = vld [vmem:[%s2712_s5 + $0x158] sm:$0xff]  }
  0x49   : > { %v553_v55 = vmax.f32 %v521_v50, 0.0  ;;  %v565_v58 = vpack.c.bf16 %v545_v42, %v544_v41  ;;  %v566_v59 = vpack.c.bf16 %v547_v46, %v546_v45  ;;  %v567_v35 = vpack.c.bf16 %v549_v49, %v548_v48  ;;  %1807 = vmatpush3.bf16.msra.mxu1 %v1998_v1  ;;  %1852 = vmatprep.subr.bf16.mxu0 %v2003_v6  ;;  %v2022_v16 = vld [vmem:[%s2712_s5 + $0x120] sm:$0xff]   ;;  %v2011_v1 = vld [vmem:[%s2712_s5 + $0xd0] sm:$0xff]  }
  0x4a   : > { %v568_v60 = vpack.c.bf16 %v551_v52, %v550_v51  ;;  %1808 = vmatprep.subr.bf16.mxu1 %v1999_v2  ;;  %1853 = vmatpush3.bf16.msra.mxu0 %v2004_v7 }
  0x4b   : > { %v569_v61 = vpack.c.bf16 %v553_v55, %v552_v54  ;;  %1854 = vmatprep.subr.bf16.mxu0 %v2009_v9  ;;  %v2006_v54 = vld [vmem:[%s2712_s5 + $0x80] sm:$0xff]  }
  0x4d   : > { %1809 = vmatpush3.bf16.msra.mxu1 %v2000_v3 }
  0x4e   : > { %1810 = vmatprep.subr.bf16.mxu1 %v2001_v4  ;;  %1855 = vmatpush3.bf16.msra.mxu0 %v2010_v10 }
  0x4f   : > { %1925 = vmatmul.mubr.msk.bf16.gmra.mrb[12].mxu0 %vm593_vm0, %v561_v53  ;;  %1856 = vmatprep.subr.bf16.mxu0 %v2013_v11 }
  0x50   : > { %1928 = vmatprep.mubr.msk.bf16.mxu0 %vm593_vm0, %v562_v56  ;;  %v2007_v56 = vld [vmem:[%s2712_s5 + $0xc8] sm:$0xff]  }
  0x51   : > { %1811 = vmatpush3.bf16.msra.mxu1 %v2002_v5  ;;  %v2012_v5 = vld [vmem:[%s2712_s5 + $0x90] sm:$0xff]  }
  0x52   : > { %1824 = vmatprep.subr.bf16.mxu1 %v2005_v8  ;;  %1857 = vmatpush3.bf16.msra.mxu0 %v2014_v12  ;;  %v2015_v8 = vld [vmem:[%s2712_s5 + $0xd8] sm:$0xff]  }
  0x53   : > { %1858 = vmatprep.subr.bf16.mxu0 %v2017_v13 }
  0x56   : > { %1859 = vmatpush3.bf16.msra.mxu0 %v2018_v14 }
  0x57   : > { %1929 = vmatmul.mubr.msk.bf16.gmra.mrb[16].mxu0 %vm593_vm0, %v563_v34  ;;  %1860 = vmatprep.subr.bf16.mxu0 %v2021_v15 }
  0x58   : > { %1932 = vmatprep.mubr.msk.bf16.mxu0 %vm593_vm0, %v564_v57 }
  0x5a   : > { %1861 = vmatpush3.bf16.msra.mxu0 %v2022_v16  ;;  %v2016_v16 = vld [vmem:[%s2712_s5 + $0x98] sm:$0xff]  }
  0x5b   : > { %1862 = vmatprep.subr.bf16.mxu0 %v2025_v17 }
  0x5e   : > { %1863 = vmatpush3.bf16.msra.mxu0 %v2026_v18 }
  0x5f   : > { %1933 = vmatmul.mubr.msk.bf16.gmra.mrb[20].mxu0 %vm593_vm0, %v565_v58  ;;  %1864 = vmatprep.subr.bf16.mxu0 %v2029_v19 }
  0x60   : > { %1936 = vmatprep.mubr.msk.bf16.mxu0 %vm593_vm0, %v566_v59 }
  0x62   : > { %1865 = vmatpush3.bf16.msra.mxu0 %v2030_v20  ;;  %v2019_v20 = vld [vmem:[%s2712_s5 + $0xe0] sm:$0xff]  }
  0x63   : > { %1866 = vmatprep.subr.bf16.mxu0 %v2033_v21 }
  0x66   : > { %1867 = vmatpush3.bf16.msra.mxu0 %v2034_v22 }
  0x67   : > { %1937 = vmatmul.mubr.msk.bf16.gmra.mrb[24].mxu0 %vm593_vm0, %v567_v35 }
  0x68   : > { %1940 = vmatprep.mubr.msk.bf16.mxu0 %vm593_vm0, %v568_v60 }
  0x6f   : > { %1941 = vmatmul.mubr.msk.bf16.gmra.mrb[28].mxu0 %vm593_vm0, %v569_v61 }
 0x10a   : > { %v1914_v24 = vpop.f32.mrb[0].mxu0 }
 0x10b   : > { %v685_v25 = vadd.f32 %v1914_v24, %v2523_v23  ;;  %v676_v26 = vpop.f32.mrb[1].mxu0 }
 0x10c   : > { %v677_v27 = vadd.f32 %v2523_v23, %v676_v26  ;;  %v1915_v28 = vpop.f32.mrb[2].mxu0 }
 0x10d   : > { %v688_v29 = vadd.f32 %v1915_v28, %v2523_v23  ;;  %v679_v30 = vpop.f32.mrb[3].mxu0  ;;  %v805_v32 = vmax.f32 %v685_v25, 0.0  ;;  %v2020_v25 = vld [vmem:[%s2712_s5 + $0xa0] sm:$0xff]  }
 0x10e   : > { %v680_v31 = vadd.f32 %v2523_v23, %v679_v30  ;;  %v803_v36 = vmax.f32 %v677_v27, 0.0 }
 0x10f   : > { %v806_v33 = vmax.f32 %v688_v29, 0.0  ;;  %v2023_v29 = vld [vmem:[%s2712_s5 + $0xe8] sm:$0xff]  }
 0x110   : > { %v804_v37 = vmax.f32 %v680_v31, 0.0 }
 0x111   : > { %v836_v38 = vpack.c.bf16 %v806_v33, %v805_v32 }
 0x112   : > { %v835_v39 = vpack.c.bf16 %v804_v37, %v803_v36  ;;  %v1918_v40 = vpop.f32.mrb[4].mxu0 }
 0x113   : > { %v701_v41 = vadd.f32 %v1918_v40, %v2523_v23  ;;  %v692_v42 = vpop.f32.mrb[5].mxu0 }
 0x114   : > { %v693_v43 = vadd.f32 %v2523_v23, %v692_v42  ;;  %v1919_v44 = vpop.f32.mrb[6].mxu0 }
 0x115   : > { %v704_v45 = vadd.f32 %v1919_v44, %v2523_v23  ;;  %v695_v46 = vpop.f32.mrb[7].mxu0  ;;  %v809_v48 = vmax.f32 %v701_v41, 0.0  ;;  %v2027_v41 = vld [vmem:[%s2712_s5 + $0xf0] sm:$0xff]  }
 0x116   : > { %v696_v47 = vadd.f32 %v2523_v23, %v695_v46  ;;  %v807_v50 = vmax.f32 %v693_v43, 0.0  ;;  %v2028_v46 = vld [vmem:[%s2712_s5 + $0xb0] sm:$0xff]  }
 0x117   : > { %v810_v49 = vmax.f32 %v704_v45, 0.0 }
 0x118   : > { %v808_v51 = vmax.f32 %v696_v47, 0.0 }
 0x119   : > { %v838_v52 = vpack.c.bf16 %v810_v49, %v809_v48  ;;  %v2031_v49 = vld [vmem:[%s2712_s5 + $0xf8] sm:$0xff]  }
 0x11a   : > { %v837_v53 = vpack.c.bf16 %v808_v51, %v807_v50  ;;  %v1922_v55 = vpop.f32.mrb[8].mxu0 }
 0x11b   : > { %v717_v34 = vadd.f32 %v1922_v55, %v2523_v23  ;;  %v708_v57 = vpop.f32.mrb[9].mxu0 }
 0x11c   : > { %1427 = vmatprep.mubr.bf16.mxu1 %v837_v53  ;;  %v709_v58 = vadd.f32 %v2523_v23, %v708_v57  ;;  %v1923_v59 = vpop.f32.mrb[10].mxu0 }
 0x11d   : > { %1428 = vmatmul.mubr.bf16.vlgmr.msra.gmra.mrb[0].mxu1 %v835_v39  ;;  %v813_v35 = vmax.f32 %v717_v34, 0.0  ;;  %v720_v60 = vadd.f32 %v1923_v59, %v2523_v23  ;;  %v711_v61 = vpop.f32.mrb[11].mxu0  ;;  %v2024_v39 = vld [vmem:[%s2712_s5 + $0xa8] sm:$0xff]   ;;  %v2032_v34 = vld [vmem:[%s2712_s5 + $0xb8] sm:$0xff]  }
 0x11e   : > { %1825 = vmatpush3.bf16.msra.mxu1 %v2006_v54  ;;  %1435 = vmatprep.mubr.bf16.mxu1 %v838_v52  ;;  %v811_v63 = vmax.f32 %v709_v58, 0.0  ;;  %v712_v0 = vadd.f32 %v2523_v23, %v711_v61  ;;  %v2035_v58 = vld [vmem:[%s2712_s5 + $0x1c0] sm:$0xff]  }
 0x11f   : > { %1826 = vmatprep.subr.bf16.mxu1 %v2007_v56  ;;  %v814_v2 = vmax.f32 %v720_v60, 0.0  ;;  %v2036_v61 = vld [vmem:[%s2712_s5 + $0x180] sm:$0xff]  }
 0x120   : > { %v812_v3 = vmax.f32 %v712_v0, 0.0 }
 0x121   : > { %v2549_v4 = vpack.c.bf16 %v814_v2, %v813_v35 }
 0x122   : > { %1827 = vmatpush3.bf16.msra.mxu1 %v2008_v62  ;;  %v2554_v6 = vpack.c.bf16 %v812_v3, %v811_v63  ;;  %v1926_v7 = vpop.f32.mrb[12].mxu0  ;;  %v2037_v63 = vld [vmem:[%s2712_s5 + $0x1c8] sm:$0xff]  }
 0x123   : > { %1828 = vmatprep.subr.bf16.mxu1 %v2011_v1  ;;  %v733_v9 = vadd.f32 %v1926_v7, %v2523_v23  ;;  %v724_v10 = vpop.f32.mrb[13].mxu0 }
 0x124   : > { %v725_v11 = vadd.f32 %v2523_v23, %v724_v10  ;;  %v1927_v12 = vpop.f32.mrb[14].mxu0 }
 0x125   : > { %1436 = vmatmul.mubr.bf16.gmra.mrb[4].mxu1 %v836_v38  ;;  %v817_v13 = vmax.f32 %v733_v9, 0.0  ;;  %v736_v14 = vadd.f32 %v1927_v12, %v2523_v23  ;;  %v727_v15 = vpop.f32.mrb[15].mxu0  ;;  %v2038_v9 = vld [vmem:[%s2712_s5 + $0x188] sm:$0xff]  }
 0x126   : > { %1829 = vmatpush3.bf16.msra.mxu1 %v2012_v5  ;;  %v815_v17 = vmax.f32 %v725_v11, 0.0  ;;  %v728_v18 = vadd.f32 %v2523_v23, %v727_v15  ;;  %v2040_v15 = vld [vmem:[%s2712_s5 + $0x190] sm:$0xff]  }
 0x127   : > { %1830 = vmatprep.subr.bf16.mxu1 %v2015_v8  ;;  %v818_v19 = vmax.f32 %v736_v14, 0.0 }
 0x128   : > { %v816_v21 = vmax.f32 %v728_v18, 0.0  ;;  %v2041_v18 = vld [vmem:[%s2712_s5 + $0x1d8] sm:$0xff]  }
 0x129   : > { %v842_v22 = vpack.c.bf16 %v818_v19, %v817_v13 }
 0x12a   : > { %1831 = vmatpush3.bf16.msra.mxu1 %v2016_v16  ;;  %v841_v24 = vpack.c.bf16 %v816_v21, %v815_v17  ;;  %v1930_v26 = vpop.f32.mrb[16].mxu0 }
 0x12b   : > { %1832 = vmatprep.subr.bf16.mxu1 %v2019_v20  ;;  %v749_v27 = vadd.f32 %v1930_v26, %v2523_v23  ;;  %v740_v28 = vpop.f32.mrb[17].mxu0 }
 0x12c   : > { %v741_v30 = vadd.f32 %v2523_v23, %v740_v28  ;;  %v1931_v31 = vpop.f32.mrb[18].mxu0  ;;  %1476 = vmatprep.mubr.bf16.mxu1 %v841_v24 }
 0x12d   : > { %v821_v32 = vmax.f32 %v749_v27, 0.0  ;;  %v752_v33 = vadd.f32 %v1931_v31, %v2523_v23  ;;  %v743_v36 = vpop.f32.mrb[19].mxu0  ;;  %v2042_v27 = vld [vmem:[%s2712_s5 + $0x198] sm:$0xff]  }
 0x12e   : > { %1833 = vmatpush3.bf16.msra.mxu1 %v2020_v25  ;;  %v819_v37 = vmax.f32 %v741_v30, 0.0  ;;  %v744_v38 = vadd.f32 %v2523_v23, %v743_v36  ;;  %v2043_v30 = vld [vmem:[%s2712_s5 + $0x1e0] sm:$0xff]  }
 0x12f   : > { %v822_v40 = vmax.f32 %v752_v33, 0.0  ;;  %1834 = vmatprep.subr.bf16.mxu1 %v2023_v29  ;;  %v2044_v33 = vld [vmem:[%s2712_s5 + $0x1a0] sm:$0xff]  }
 0x130   : > { %v820_v42 = vmax.f32 %v744_v38, 0.0  ;;  %v2047_v38 = vld [vmem:[%s2712_s5 + $0x1f0] sm:$0xff]  }
 0x131   : > { %v844_v43 = vpack.c.bf16 %v822_v40, %v821_v32  ;;  %v2049_v40 = vld [vmem:[%s2712_s5 + $0x1f8] sm:$0xff]  }
 0x132   : > { %v843_v44 = vpack.c.bf16 %v820_v42, %v819_v37  ;;  %1835 = vmatpush3.bf16.msra.mxu1 %v2024_v39  ;;  %v1934_v45 = vpop.f32.mrb[20].mxu0  ;;  %v2045_v37 = vld [vmem:[%s2712_s5 + $0x1e8] sm:$0xff]   ;;  %v2048_v39 = vld [vmem:[%s2712_s5 + $0x1b0] sm:$0xff]  }
 0x133   : > { %v765_v47 = vadd.f32 %v1934_v45, %v2523_v23  ;;  %v756_v48 = vpop.f32.mrb[21].mxu0  ;;  %1836 = vmatprep.subr.bf16.mxu1 %v2027_v41  ;;  %v2050_v41 = vld [vmem:[%s2712_s5 + $0x1b8] sm:$0xff]  }
 0x134   : > { %v757_v50 = vadd.f32 %v2523_v23, %v756_v48  ;;  %v1935_v51 = vpop.f32.mrb[22].mxu0 }
 0x135   : > { %v825_v52 = vmax.f32 %v765_v47, 0.0  ;;  %v768_v53 = vadd.f32 %v1935_v51, %v2523_v23  ;;  %v759_v54 = vpop.f32.mrb[23].mxu0 }
 0x136   : > { %v823_v55 = vmax.f32 %v757_v50, 0.0  ;;  %v760_v56 = vadd.f32 %v2523_v23, %v759_v54  ;;  %1837 = vmatpush3.bf16.msra.mxu1 %v2028_v46 }
 0x137   : > { %v826_v57 = vmax.f32 %v768_v53, 0.0  ;;  %1838 = vmatprep.subr.bf16.mxu1 %v2031_v49 }
 0x138   : > { %v824_v59 = vmax.f32 %v760_v56, 0.0 }
 0x139   : > { %v846_v35 = vpack.c.bf16 %v826_v57, %v825_v52 }
 0x13a   : > { %v845_v60 = vpack.c.bf16 %v824_v59, %v823_v55  ;;  %1839 = vmatpush3.bf16.msra.mxu1 %v2032_v34  ;;  %v1938_v62 = vpop.f32.mrb[24].mxu0 }
 0x13b   : > { %1880 = vmatprep.subr.bf16.mxu1 %v2035_v58  ;;  %v781_v0 = vadd.f32 %v1938_v62, %v2523_v23  ;;  %v772_v1 = vpop.f32.mrb[25].mxu0 }
 0x13c   : > { %1525 = vmatprep.mubr.bf16.mxu0 %v845_v60  ;;  %v773_v2 = vadd.f32 %v2523_v23, %v772_v1  ;;  %v1939_v3 = vpop.f32.mrb[26].mxu0 }
 0x13d   : > { %1477 = vmatmul.mubr.bf16.vlgmr.msra.gmra.mrb[8].mxu1 %v2554_v6  ;;  %1526 = vmatmul.mubr.bf16.vlgmr.msra.gmra.mrb[32].mxu0 %v843_v44  ;;  %v829_v5 = vmax.f32 %v781_v0, 0.0  ;;  %v784_v7 = vadd.f32 %v1939_v3, %v2523_v23  ;;  %v775_v8 = vpop.f32.mrb[27].mxu0  ;;  %v2039_v6 = vld [vmem:[%s2712_s5 + $0x1d0] sm:$0xff]  }
 0x13e   : > { %1484 = vmatprep.mubr.bf16.mxu1 %v842_v22  ;;  %1881 = vmatpush3.bf16.msra.mxu1 %v2036_v61  ;;  %v827_v10 = vmax.f32 %v773_v2, 0.0  ;;  %v776_v11 = vadd.f32 %v2523_v23, %v775_v8 }
 0x13f   : > { %1882 = vmatprep.subr.bf16.mxu1 %v2037_v63  ;;  %1533 = vmatprep.mubr.bf16.mxu0 %v846_v35  ;;  %v830_v12 = vmax.f32 %v784_v7, 0.0 }
 0x140   : > { %v828_v13 = vmax.f32 %v776_v11, 0.0 }
 0x141   : > { %v848_v14 = vpack.c.bf16 %v830_v12, %v829_v5 }
 0x142   : > { %1883 = vmatpush3.bf16.msra.mxu1 %v2038_v9  ;;  %v847_v16 = vpack.c.bf16 %v828_v13, %v827_v10  ;;  %v1942_v17 = vpop.f32.mrb[28].mxu0 }
 0x143   : > { %1884 = vmatprep.subr.bf16.mxu1 %v2039_v6  ;;  %v797_v19 = vadd.f32 %v1942_v17, %v2523_v23  ;;  %v788_v20 = vpop.f32.mrb[29].mxu0 }
 0x144   : > { %v789_v21 = vadd.f32 %v2523_v23, %v788_v20  ;;  %v1943_v22 = vpop.f32.mrb[30].mxu0 }
 0x145   : > { %1485 = vmatmul.mubr.bf16.gmra.mrb[12].mxu1 %v2549_v4  ;;  %1534 = vmatmul.mubr.bf16.gmra.mrb[36].mxu0 %v844_v43  ;;  %v833_v24 = vmax.f32 %v797_v19, 0.0  ;;  %v800_v25 = vadd.f32 %v1943_v22, %v2523_v23  ;;  %v791_v26 = vpop.f32.mrb[31].mxu0 }
 0x146   : > { %1885 = vmatpush3.bf16.msra.mxu1 %v2040_v15  ;;  %v831_v28 = vmax.f32 %v789_v21, 0.0  ;;  %v792_v29 = vadd.f32 %v2523_v23, %v791_v26  ;;  %v2046_v23 = vld [vmem:[%s2712_s5 + $0x1a8] sm:$0xff]  }
 0x147   : > { %1886 = vmatprep.subr.bf16.mxu1 %v2041_v18  ;;  %v834_v31 = vmax.f32 %v800_v25, 0.0 }
 0x148   : > { %v832_v4 = vmax.f32 %v792_v29, 0.0 }
 0x149   : > { %v850_v32 = vpack.c.bf16 %v834_v31, %v833_v24 }
 0x14a   : > { %1887 = vmatpush3.bf16.msra.mxu1 %v2042_v27  ;;  %v849_v36 = vpack.c.bf16 %v832_v4, %v831_v28 }
 0x14b   : > { %1888 = vmatprep.subr.bf16.mxu1 %v2043_v30 }
 0x14c   : > { %1574 = vmatprep.mubr.bf16.mxu1 %v849_v36 }
 0x14e   : > { %1889 = vmatpush3.bf16.msra.mxu1 %v2044_v33 }
 0x14f   : > { %1890 = vmatprep.subr.bf16.mxu1 %v2045_v37 }
 0x152   : > { %1891 = vmatpush3.bf16.msra.mxu1 %v2046_v23 }
 0x153   : > { %1892 = vmatprep.subr.bf16.mxu1 %v2047_v38 }
 0x156   : > { %1893 = vmatpush3.bf16.msra.mxu1 %v2048_v39 }
 0x157   : > { %1894 = vmatprep.subr.bf16.mxu1 %v2049_v40 }
 0x15a   : > { %1895 = vmatpush3.bf16.msra.mxu1 %v2050_v41 }
 0x15d   : > { %1575 = vmatmul.mubr.bf16.vlgmr.msra.gmra.mrb[16].mxu1 %v847_v16 }
 0x15e   : > { %1582 = vmatprep.mubr.bf16.mxu1 %v850_v32 }
 0x165   : > { %1583 = vmatmul.mubr.bf16.gmra.mrb[20].mxu1 %v848_v14 }
 0x1f0   : > { %v1812_v42 = vpop.f32.mrb[0].mxu1 }
 0x1f1   : > { %v1813_v43 = vpop.f32.mrb[1].mxu1 }
 0x1f2   : > { %v1814_v44 = vadd.f32 %v1813_v43, %v1812_v42  ;;  %v1815_v45 = vpop.f32.mrb[2].mxu1 }
 0x1f3   : > { %v1816_v46 = vpop.f32.mrb[3].mxu1 }
 0x1f4   : > { %v1817_v47 = vadd.f32 %v1816_v46, %v1815_v45 }
 0x1f8   : > { %v1818_v48 = vpop.f32.mrb[4].mxu1 }
 0x1f9   : > { %v1819_v49 = vpop.f32.mrb[5].mxu1 }
 0x1fa   : > { %v1820_v50 = vadd.f32 %v1819_v49, %v1818_v48  ;;  %v1821_v51 = vpop.f32.mrb[6].mxu1 }
 0x1fb   : > { %v1822_v52 = vpop.f32.mrb[7].mxu1 }
 0x1fc   : > { %v1823_v53 = vadd.f32 %v1822_v52, %v1821_v51 }
 0x210   : > { %v1840_v54 = vpop.f32.mrb[8].mxu1  ;;  %v1868_v55 = vpop.f32.mrb[32].mxu0 }
 0x211   : > { %v1841_v56 = vpop.f32.mrb[9].mxu1  ;;  %v1869_v34 = vpop.f32.mrb[33].mxu0 }
 0x212   : > { %v1842_v57 = vadd.f32 %v1841_v56, %v1840_v54  ;;  %v1843_v58 = vpop.f32.mrb[10].mxu1  ;;  %v1870_v59 = vadd.f32 %v1869_v34, %v1868_v55  ;;  %v1871_v35 = vpop.f32.mrb[34].mxu0 }
 0x213   : > { %v1844_v60 = vpop.f32.mrb[11].mxu1  ;;  %v1872_v61 = vpop.f32.mrb[35].mxu0 }
 0x214   : > { %v1479_v62 = vadd.f32 %v1842_v57, %v1814_v44  ;;  %v1845_v63 = vadd.f32 %v1844_v60, %v1843_v58  ;;  %v1873_v0 = vadd.f32 %v1872_v61, %v1871_v35 }
 0x216   : > { %v1528_v1 = vadd.f32 %v1870_v59, %v1479_v62  ;;  %v1482_v2 = vadd.f32 %v1845_v63, %v1817_v47 }
 0x218   : > { %v1531_v3 = vadd.f32 %v1873_v0, %v1482_v2  ;;  %v1846_v5 = vpop.f32.mrb[12].mxu1  ;;  %v1874_v7 = vpop.f32.mrb[36].mxu0 }
 0x219   : > { %v1847_v8 = vpop.f32.mrb[13].mxu1  ;;  %v1875_v9 = vpop.f32.mrb[37].mxu0 }
 0x21a   : > { %v1848_v10 = vadd.f32 %v1847_v8, %v1846_v5  ;;  %v1849_v11 = vpop.f32.mrb[14].mxu1  ;;  %v1876_v6 = vadd.f32 %v1875_v9, %v1874_v7  ;;  %v1877_v12 = vpop.f32.mrb[38].mxu0 }
 0x21b   : > { %v1850_v13 = vpop.f32.mrb[15].mxu1  ;;  %v1878_v14 = vpop.f32.mrb[39].mxu0 }
 0x21c   : > { %v1487_v15 = vadd.f32 %v1848_v10, %v1820_v50  ;;  %v1851_v16 = vadd.f32 %v1850_v13, %v1849_v11  ;;  %v1879_v17 = vadd.f32 %v1878_v14, %v1877_v12 }
 0x21e   : > { %v1536_v18 = vadd.f32 %v1876_v6, %v1487_v15  ;;  %v1490_v19 = vadd.f32 %v1851_v16, %v1823_v53 }
 0x220   : > { %v1539_v20 = vadd.f32 %v1879_v17, %v1490_v19 }
 0x230   : > { %v1896_v21 = vpop.f32.mrb[16].mxu1 }
 0x231   : > { %v1897_v22 = vpop.f32.mrb[17].mxu1 }
 0x232   : > { %v1898_v24 = vadd.f32 %v1897_v22, %v1896_v21  ;;  %v1899_v25 = vpop.f32.mrb[18].mxu1 }
 0x233   : > { %v1900_v26 = vpop.f32.mrb[19].mxu1 }
 0x234   : > { %v1577_v27 = vadd.f32 %v1898_v24, %v1528_v1  ;;  %v1901_v28 = vadd.f32 %v1900_v26, %v1899_v25 }
 0x236   : > { %1591 = vst [vmem:[%s408_s17] sm:$0xff] %v1577_v27  ;;  %v1580_v29 = vadd.f32 %v1901_v28, %v1531_v3 }
 0x238   : > { %1592 = vst [vmem:[%s408_s17 + $0x8] sm:$0xff] %v1580_v29  ;;  %v1902_v30 = vpop.f32.mrb[20].mxu1 }
 0x239   : > { %v1903_v31 = vpop.f32.mrb[21].mxu1 }
 0x23a   : > { %v1904_v4 = vadd.f32 %v1903_v31, %v1902_v30  ;;  %v1905_v32 = vpop.f32.mrb[22].mxu1 }
 0x23b   : > { %v1906_v33 = vpop.f32.mrb[23].mxu1 }
 0x23c   : > { %v1585_v36 = vadd.f32 %v1904_v4, %v1536_v18  ;;  %v1907_v37 = vadd.f32 %v1906_v33, %v1905_v32 }
 0x23e   : > { %1593 = vst [vmem:[%s408_s17 + $0x10] sm:$0xff] %v1585_v36  ;;  %v1588_v23 = vadd.f32 %v1907_v37, %v1539_v20 }
 0x240   : > { %1594 = vst [vmem:[%s408_s17 + $0x18] sm:$0xff] %v1588_v23 }
 0x241   : > { %2064 = shalt.err (!%p2061_p5)
}
 0x242   : > { %s2065_s14 = scalar_lea.hbm %s2664_s29, 512  ;;  %s2069_s16 = scalar_lea.hbm %s2713_s6, 2048 }
 0x243   : > { %p2066_p7 = scmp.ne.s32.totalorder %s2664_s29, %s2065_s14  ;;  %p2070_p11 = scmp.lt.u32.totalorder %s2664_s29, %s2713_s6 }
 0x244   : > { %p2071_p12 = scmp.lt.u32.totalorder %s2069_s16, %s2065_s14  ;;  %p2073_p0 = scmp.lt.u32.totalorder %s2065_s14, %s2664_s29 }
 0x245   : > { %p2067_p9 = pnand %p2066_p7, %p2191_p6 }
 0x246   : > { %p2072_p13 = por %p2071_p12, %p2070_p11 }
 0x247   : > { %p2068_p10 = pneg %p2067_p9 }
 0x248   : > { %p2074_p1 = por %p2073_p0, %p2072_p13 }
 0x24a   : > { %p2075_p2 = pnand %p2074_p1, %p2068_p10 }
 0x24c   : > { %2078 = shalt.err (!%p2075_p2)
}
 0x24d   : > { %s2116_s26 = smov 128   ;;  %s2117_s28 = smov 8  }
 0x24e   : > { %1944 = dma.vmem_to_hbm [thread:$0]  (%p2191_p6), %s2659_s19, 512, %s2664_s29, %s1596_s9, %s2116_s26, %s2116_s26, %s2117_s28  }
 0x24f PF: > { %p1950_p3 = scmp.ge.s32.totalorder %s2113_s24, 2  ;;  %s1624_s10 = sand.u32 1, %s2101_s21  }
 0x250   : > { %s1625_s25 = scalar_lea.sflag [#allocation5], %s1624_s10 }
 0x251   : > { %p1947_p4 = pnand %p1950_p3, %p2195_p8 }
 0x253   : > { %2096 = dma.done.wait (!%p1947_p4), %s1625_s25, 512  }
 0x254   : > { %2098 = vsyncadd (!%p1947_p4), %s1625_s25, 4294966784  ;;  %p16_p5 = scmp.ge.s32.totalorder %s2176_s27, 6   ;;  %s2716_s21 = smov %s2105_s22 }
 0x255   : > { %s2717_s22 = smov %s2109_s23  ;;  %s2718_s23 = smov %s2189_s30 }
 0x256   : > { %s2719_s24 = smov %s2176_s27  ;;  %18 = sbr.rel (!%p16_p5) target bundleno = 3 (0x3), region = 122 }
 0x25d   :  { %1630 = vsyncpa [#allocation5], 1 }
 0x25e   :  { %1632 = vsyncpa [#allocation5 + $0x1], 1 }

// kernel: _forward.1
= control target key start
LH: loop header
LB: loop body
LE: loop exit
PB: predicated region body
PF: predicated region fallthrough
CT: control target
= control target key end

     0   :  { %11 = vsyncpa [#allocation5], 0  ;;  %s2707_s0 = inlined_call_operand.vmem [shape: f32[8,128,32], index: 0, kind: input, shape index: {}]   ;;  %s2708_s1 = inlined_call_operand.vmem [shape: f32[1,32], index: 1, kind: input, shape index: {}]   ;;  %s2709_s2 = inlined_call_operand.vmem [shape: f32[1,32], index: 2, kind: input, shape index: {}]   ;;  %s2710_s3 = inlined_call_operand.vmem [shape: bf16[32,128], index: 3, kind: input, shape index: {}]   ;;  %s2711_s4 = inlined_call_operand.vmem [shape: f32[1,128], index: 4, kind: input, shape index: {}]   ;;  %s2712_s5 = inlined_call_operand.vmem [shape: bf16[1024,128], index: 5, kind: input, shape index: {}]   ;;  %s2713_s6 = inlined_call_operand.hbm [shape: f32[128,128], index: 6, kind: output, shape index: {}]  }
   0x1   :  { %13 = vsyncpa [#allocation5 + $0x1], 0  ;;  %s2153_s21 = smov 0   ;;  %s2155_s22 = smov 0  }
   0x2   :  { %s2157_s23 = smov 0   ;;  %s2159_s24 = smov 0  }
   0x3 LB: > { %s1676_s25 = sadd.s32 4294967295, %s2113_s24   ;;  %s1677_s26 = sadd.s32 4294967294, %s2113_s24   ;;  %s2113_s24 = sphi %s2159_s24, %s2719_s24   ;;  %s2109_s23 = sphi %s2157_s23, %s2718_s23   ;;  %s2105_s22 = sphi %s2155_s22, %s2717_s22   ;;  %s2101_s21 = sphi %s2153_s21, %s2716_s21  }
   0x4   : > { %s2176_s27 = sadd.s32 1, %s2113_s24   ;;  %s26_s28 = sadd.s32 1, %s2109_s23 }
   0x5   : > { %s23_s29 = ssub.s32 %s2113_s24, %s2176_s27  ;;  %p33_p0 = scmp.ne.s32.totalorder %s2109_s23, %s2105_s22 }
   0x6   : > { %p24_p1 = scmp.eq.s32.totalorder %s23_s29, 0  ;;  %p34_p2 = scmp.eq.s32.totalorder %s2113_s24, 0 }
   0x7   : > { %p168_p3 = scmp.eq.s32.totalorder %s1676_s25, 3  ;;  %p173_p4 = scmp.ne.s32.totalorder %s2105_s22, %s2101_s21 }
   0x8   : > { %s2189_s30 = scalar_select %p24_p1, %s2109_s23, %s26_s28  }
   0x9   : > { %p35_p5 = por %p34_p2, %p33_p0  ;;  %p2191_p6 = por %p168_p3, %p33_p0 }
   0xa   : > { %p174_p7 = scmp.eq.s32.totalorder %s1677_s26, 3  ;;  %p1679_p9 = scmp.ge.s32.totalorder %s2113_s24, 4 }
   0xc   : > { %p2195_p8 = por %p174_p7, %p173_p4  ;;  %205 = sbr.rel (%p1679_p9) target bundleno = 39 (0x27), region = 36 }
  0x13   : > { %208 = sbr.rel (!%p35_p5) target bundleno = 39 (0x27), region = 40  ;;  %s210_s9 = sand.u32 (%p35_p5), 1, %s2109_s23  }
  0x14   : > { %s1776_s10 = sshll.u32 (%p35_p5), %s2113_s24, 5  ;;  %s1680_s11 = sshll.u32 (%p35_p5), %s210_s9, 8 }
  0x15   : > { %s2205_s14 = scalar_lea.vmem (%p35_p5), %s2707_s0, %s1776_s10  ;;  %s2210_s15 = scalar_lea.vmem (%p35_p5), [#allocation3], %s1680_s11 }
  0x16   : > { %v305_v0 = vld [vmem:[%s2205_s14] sm:$0xff] (%p35_p5)  ;;  %v307_v1 = vld [vmem:[%s2205_s14 + $0x8] sm:$0xff] (%p35_p5)  ;;  %v309_v2 = vld [vmem:[%s2205_s14 + $0x10] sm:$0xff] (%p35_p5) }
  0x17   : > { %306 = vst [vmem:[%s2210_s15] sm:$0xff] (%p35_p5), %v305_v0  ;;  %308 = vst [vmem:[%s2210_s15 + $0x8] sm:$0xff] (%p35_p5), %v307_v1  ;;  %v311_v3 = vld [vmem:[%s2205_s14 + $0x18] sm:$0xff] (%p35_p5)  ;;  %v313_v4 = vld [vmem:[%s2205_s14 + $0x80] sm:$0xff] (%p35_p5) }
  0x18   : > { %310 = vst [vmem:[%s2210_s15 + $0x10] sm:$0xff] (%p35_p5), %v309_v2  ;;  %v315_v5 = vld [vmem:[%s2205_s14 + $0x88] sm:$0xff] (%p35_p5)  ;;  %312 = vst [vmem:[%s2210_s15 + $0x18] sm:$0xff] (%p35_p5), %v311_v3  ;;  %v317_v6 = vld [vmem:[%s2205_s14 + $0x90] sm:$0xff] (%p35_p5) }
  0x19   : > { %314 = vst [vmem:[%s2210_s15 + $0x20] sm:$0xff] (%p35_p5), %v313_v4  ;;  %316 = vst [vmem:[%s2210_s15 + $0x28] sm:$0xff] (%p35_p5), %v315_v5  ;;  %v319_v7 = vld [vmem:[%s2205_s14 + $0x98] sm:$0xff] (%p35_p5)  ;;  %v321_v8 = vld [vmem:[%s2205_s14 + $0x100] sm:$0xff] (%p35_p5) }
  0x1a   : > { %318 = vst [vmem:[%s2210_s15 + $0x30] sm:$0xff] %v317_v6  ;;  %320 = vst [vmem:[%s2210_s15 + $0x38] sm:$0xff] %v319_v7  ;;  %v323_v9 = vld [vmem:[%s2205_s14 + $0x108] sm:$0xff]  ;;  %v325_v10 = vld [vmem:[%s2205_s14 + $0x110] sm:$0xff] }
  0x1b   : > { %322 = vst [vmem:[%s2210_s15 + $0x40] sm:$0xff] %v321_v8  ;;  %v327_v11 = vld [vmem:[%s2205_s14 + $0x118] sm:$0xff]  ;;  %324 = vst [vmem:[%s2210_s15 + $0x48] sm:$0xff] %v323_v9  ;;  %v329_v12 = vld [vmem:[%s2205_s14 + $0x180] sm:$0xff] }
  0x1c   : > { %326 = vst [vmem:[%s2210_s15 + $0x50] sm:$0xff] %v325_v10  ;;  %328 = vst [vmem:[%s2210_s15 + $0x58] sm:$0xff] %v327_v11  ;;  %v331_v13 = vld [vmem:[%s2205_s14 + $0x188] sm:$0xff]  ;;  %v333_v14 = vld [vmem:[%s2205_s14 + $0x190] sm:$0xff] }
  0x1d   : > { %330 = vst [vmem:[%s2210_s15 + $0x60] sm:$0xff] %v329_v12  ;;  %332 = vst [vmem:[%s2210_s15 + $0x68] sm:$0xff] %v331_v13  ;;  %v335_v15 = vld [vmem:[%s2205_s14 + $0x198] sm:$0xff]  ;;  %v337_v16 = vld [vmem:[%s2205_s14 + $0x200] sm:$0xff] }
  0x1e   : > { %334 = vst [vmem:[%s2210_s15 + $0x70] sm:$0xff] %v333_v14  ;;  %v339_v17 = vld [vmem:[%s2205_s14 + $0x208] sm:$0xff]  ;;  %336 = vst [vmem:[%s2210_s15 + $0x78] sm:$0xff] %v335_v15  ;;  %v341_v18 = vld [vmem:[%s2205_s14 + $0x210] sm:$0xff] }
  0x1f   : > { %338 = vst [vmem:[%s2210_s15 + $0x80] sm:$0xff] %v337_v16  ;;  %340 = vst [vmem:[%s2210_s15 + $0x88] sm:$0xff] %v339_v17  ;;  %v343_v19 = vld [vmem:[%s2205_s14 + $0x218] sm:$0xff]  ;;  %v345_v20 = vld [vmem:[%s2205_s14 + $0x280] sm:$0xff] }
  0x20   : > { %342 = vst [vmem:[%s2210_s15 + $0x90] sm:$0xff] %v341_v18  ;;  %344 = vst [vmem:[%s2210_s15 + $0x98] sm:$0xff] %v343_v19  ;;  %v347_v21 = vld [vmem:[%s2205_s14 + $0x288] sm:$0xff]  ;;  %v349_v22 = vld [vmem:[%s2205_s14 + $0x290] sm:$0xff] }
  0x21   : > { %346 = vst [vmem:[%s2210_s15 + $0xa0] sm:$0xff] %v345_v20  ;;  %v351_v23 = vld [vmem:[%s2205_s14 + $0x298] sm:$0xff]  ;;  %348 = vst [vmem:[%s2210_s15 + $0xa8] sm:$0xff] %v347_v21  ;;  %v353_v24 = vld [vmem:[%s2205_s14 + $0x300] sm:$0xff] }
  0x22   : > { %350 = vst [vmem:[%s2210_s15 + $0xb0] sm:$0xff] %v349_v22  ;;  %352 = vst [vmem:[%s2210_s15 + $0xb8] sm:$0xff] %v351_v23  ;;  %v355_v25 = vld [vmem:[%s2205_s14 + $0x308] sm:$0xff]  ;;  %v357_v26 = vld [vmem:[%s2205_s14 + $0x310] sm:$0xff] }
  0x23   : > { %354 = vst [vmem:[%s2210_s15 + $0xc0] sm:$0xff] %v353_v24  ;;  %356 = vst [vmem:[%s2210_s15 + $0xc8] sm:$0xff] %v355_v25  ;;  %v359_v27 = vld [vmem:[%s2205_s14 + $0x318] sm:$0xff]  ;;  %v361_v28 = vld [vmem:[%s2205_s14 + $0x380] sm:$0xff] }
  0x24   : > { %358 = vst [vmem:[%s2210_s15 + $0xd0] sm:$0xff] %v357_v26  ;;  %v363_v29 = vld [vmem:[%s2205_s14 + $0x388] sm:$0xff]  ;;  %360 = vst [vmem:[%s2210_s15 + $0xd8] sm:$0xff] %v359_v27  ;;  %v365_v30 = vld [vmem:[%s2205_s14 + $0x390] sm:$0xff] }
  0x25   : > { %362 = vst [vmem:[%s2210_s15 + $0xe0] sm:$0xff] %v361_v28  ;;  %364 = vst [vmem:[%s2210_s15 + $0xe8] sm:$0xff] %v363_v29  ;;  %v367_v31 = vld [vmem:[%s2205_s14 + $0x398] sm:$0xff] }
  0x26   : > { %366 = vst [vmem:[%s2210_s15 + $0xf0] sm:$0xff] %v365_v30  ;;  %368 = vst [vmem:[%s2210_s15 + $0xf8] sm:$0xff] %v367_v31 }
  0x27 PF: > { %p1683_p10 = scmp.ge.s32.totalorder %s2113_s24, 1  ;;  %p373_p11 = scmp.lt.s32.totalorder %s2113_s24, 5 }
  0x29   : > { %p374_p12 = pnand %p1683_p10, %p373_p11 }
  0x2a   : > { %v1985_v32 = vld [vmem:[%s2710_s3] sm:$0xff] (!%p374_p12)   ;;  %s2279_s18 = sand.u32 (!%p374_p12), 1, %s2105_s22   ;;  %v1986_v33 = vld [vmem:[%s2710_s3 + $0x8] sm:$0xff] (!%p374_p12)   ;;  %vm593_vm0 = vcmask (!%p374_p12), 261120   ;;  %s1777_s20 = sshll.u32 (!%p374_p12), %s1676_s25, 9 }
  0x2b   : > { %377 = sbr.rel (%p374_p12) target bundleno = 591 (0x24f), region = 78  ;;  %s1684_s26 = sshll.u32 (!%p374_p12), %s2279_s18, 8  ;;  %1908 = vmatprep.subr.bf16.mxu0 (!%p374_p12), %v1985_v32  ;;  %v2288_v34 = vld [vmem:[%s2708_s1] ss:$0 sm:$0xff] (!%p374_p12) }
  0x2c   : > { %v2293_v35 = vld [vmem:[%s2709_s2] ss:$0 sm:$0xff] (!%p374_p12)  ;;  %1909 = vmatpush3.bf16.msra.mxu0 (!%p374_p12), %v1985_v32  ;;  %s2295_s11 = scalar_lea.vmem (!%p374_p12), [#allocation3], %s1684_s26  ;;  %s1685_s16 = sshll.u32 (!%p374_p12), %s2279_s18, 5 }
  0x2d   : > { %v412_v36 = vld [vmem:[%s2295_s11] sm:$0xff] (!%p374_p12)  ;;  %v413_v37 = vld [vmem:[%s2295_s11 + $0x8] sm:$0xff] (!%p374_p12)  ;;  %v414_v38 = vld [vmem:[%s2295_s11 + $0x10] sm:$0xff] (!%p374_p12)  ;;  %1910 = vmatprep.subr.bf16.mxu0 (!%p374_p12), %v1986_v33  ;;  %s408_s17 = scalar_lea.vmem (!%p374_p12), [#allocation4], %s1685_s16  ;;  %s2664_s29 = scalar_lea.hbm (!%p374_p12), %s2713_s6, %s1777_s20 }
  0x2e   : > { %v451_v39 = vmul.f32 (!%p374_p12), %v2288_v34, %v412_v36  ;;  %v452_v40 = vmul.f32 (!%p374_p12), %v2288_v34, %v413_v37  ;;  %v415_v41 = vld [vmem:[%s2295_s11 + $0x18] sm:$0xff] (!%p374_p12)  ;;  %v453_v42 = vmul.f32 (!%p374_p12), %v2288_v34, %v414_v38  ;;  %v416_v43 = vld [vmem:[%s2295_s11 + $0x20] sm:$0xff] (!%p374_p12)  ;;  %v417_v44 = vld [vmem:[%s2295_s11 + $0x28] sm:$0xff] (!%p374_p12)  ;;  %s1609_s19 = sshll.u32 (!%p374_p12), %s408_s17, 4  ;;  %s1596_s9 = scalar_lea.sflag (!%p374_p12), [#allocation5], %s2279_s18  ;;  %s2659_s19 = int_to_ptr.vmem [resolvable:$true] %s1609_s19 }
  0x2f   : > { %v454_v45 = vmul.f32 (!%p374_p12), %v2288_v34, %v415_v41  ;;  %v455_v46 = vmul.f32 (!%p374_p12), %v2288_v34, %v416_v43  ;;  %v456_v47 = vmul.f32 (!%p374_p12), %v2288_v34, %v417_v44  ;;  %v418_v48 = vld [vmem:[%s2295_s11 + $0x30] sm:$0xff] (!%p374_p12)  ;;  %v419_v49 = vld [vmem:[%s2295_s11 + $0x38] sm:$0xff] (!%p374_p12)  ;;  %v420_v58 = vld [vmem:[%s2295_s11 + $0x40] sm:$0xff] (!%p374_p12)  ;;  %s2051_s10 = scalar_lea.vmem (!%p374_p12), %s2659_s19, 512  ;;  %s2115_s25 = smov (!%p374_p12), [#allocation4]  }
  0x30   : > { %v490_v50 = vadd.f32 (!%p374_p12), %v2293_v35, %v451_v39  ;;  %v491_v51 = vadd.f32 (!%p374_p12), %v2293_v35, %v452_v40  ;;  %v492_v52 = vadd.f32 (!%p374_p12), %v2293_v35, %v453_v42  ;;  %v457_v53 = vmul.f32 (!%p374_p12), %v2288_v34, %v418_v48  ;;  %1911 = vmatpush3.bf16.msra.mxu0 (!%p374_p12), %v1986_v33  ;;  %v421_v59 = vld [vmem:[%s2295_s11 + $0x48] sm:$0xff] (!%p374_p12)  ;;  %v422_v0 = vld [vmem:[%s2295_s11 + $0x50] sm:$0xff] (!%p374_p12)  ;;  %v423_v5 = vld [vmem:[%s2295_s11 + $0x58] sm:$0xff] (!%p374_p12)  ;;  %p2052_p13 = scmp.ne.s32.totalorder (!%p374_p12), %s2659_s19, %s2051_s10  ;;  %s2055_s12 = sshll.u32 (!%p374_p12), %s2115_s25, 4  ;;  %s2056_s12 = int_to_ptr.vmem [resolvable:$false] %s2055_s12 }
  0x31   : > { %v493_v54 = vadd.f32 (!%p374_p12), %v2293_v35, %v454_v45  ;;  %v494_v55 = vadd.f32 (!%p374_p12), %v2293_v35, %v455_v46  ;;  %v495_v56 = vadd.f32 (!%p374_p12), %v2293_v35, %v456_v47  ;;  %v458_v57 = vmul.f32 (!%p374_p12), %v2288_v34, %v419_v49  ;;  %v424_v6 = vld [vmem:[%s2295_s11 + $0x60] sm:$0xff] (!%p374_p12)  ;;  %v425_v10 = vld [vmem:[%s2295_s11 + $0x68] sm:$0xff] (!%p374_p12)  ;;  %v426_v11 = vld [vmem:[%s2295_s11 + $0x70] sm:$0xff] (!%p374_p12)  ;;  %s2057_s13 = scalar_lea.vmem (!%p374_p12), %s2056_s12, 1024  ;;  %p2058_p2 = scmp.lt.s32.totalorder (!%p374_p12), %s2659_s19, %s2056_s12 }
  0x32   : > { %v522_v60 = vmax.f32 %v490_v50, 0.0  ;;  %v523_v61 = vmax.f32 %v491_v51, 0.0  ;;  %v524_v62 = vmax.f32 %v492_v52, 0.0  ;;  %v496_v63 = vadd.f32 %v2293_v35, %v457_v53  ;;  %v427_v20 = vld [vmem:[%s2295_s11 + $0x78] sm:$0xff]  ;;  %v428_v21 = vld [vmem:[%s2295_s11 + $0x80] sm:$0xff]  ;;  %v429_v26 = vld [vmem:[%s2295_s11 + $0x88] sm:$0xff]  ;;  %p2053_p0 = pnand %p2052_p13, %p2191_p6  ;;  %p2059_p3 = scmp.lt.s32.totalorder %s2057_s13, %s2051_s10 }
  0x33   : > { %v525_v1 = vmax.f32 %v493_v54, 0.0  ;;  %v526_v2 = vmax.f32 %v494_v55, 0.0  ;;  %v527_v3 = vmax.f32 %v495_v56, 0.0  ;;  %v497_v4 = vadd.f32 %v2293_v35, %v458_v57  ;;  %v430_v27 = vld [vmem:[%s2295_s11 + $0x90] sm:$0xff]  ;;  %v431_v32 = vld [vmem:[%s2295_s11 + $0x98] sm:$0xff]  ;;  %v1987_v33 = vld [vmem:[%s2712_s5 + $0x40] sm:$0xff]  }
  0x34   : > { %v554_v7 = vpack.c.bf16 %v523_v61, %v522_v60  ;;  %v459_v8 = vmul.f32 %v2288_v34, %v420_v58  ;;  %v460_v9 = vmul.f32 %v2288_v34, %v421_v59  ;;  %v528_v14 = vmax.f32 %v496_v63, 0.0  ;;  %v1988_v36 = vld [vmem:[%s2712_s5] sm:$0xff]   ;;  %v433_v40 = vld [vmem:[%s2295_s11 + $0xa8] sm:$0xff]  ;;  %v434_v44 = vld [vmem:[%s2295_s11 + $0xb0] sm:$0xff]  ;;  %1796 = vmatprep.subr.bf16.mxu1 %v1987_v33  ;;  %p2054_p1 = pneg %p2053_p0  ;;  %p2060_p4 = por %p2059_p3, %p2058_p2 }
  0x35   : > { %v555_v12 = vpack.c.bf16 %v525_v1, %v524_v62  ;;  %v556_v13 = vpack.c.bf16 %v527_v3, %v526_v2  ;;  %v461_v15 = vmul.f32 %v2288_v34, %v422_v0  ;;  %v462_v18 = vmul.f32 %v2288_v34, %v423_v5  ;;  %v432_v39 = vld [vmem:[%s2295_s11 + $0xa0] sm:$0xff]  ;;  %v1989_v41 = vld [vmem:[%s2712_s5 + $0x48] sm:$0xff]   ;;  %v435_v49 = vld [vmem:[%s2295_s11 + $0xb8] sm:$0xff]  ;;  %1797 = vmatpush3.bf16.msra.mxu1 %v1988_v36 }
  0x36   : > { %1912 = vmatprep.mubr.msk.bf16.mxu0 %vm593_vm0, %v554_v7  ;;  %v498_v16 = vadd.f32 %v2293_v35, %v459_v8  ;;  %v499_v17 = vadd.f32 %v2293_v35, %v460_v9  ;;  %v463_v19 = vmul.f32 %v2288_v34, %v424_v6  ;;  %v529_v22 = vmax.f32 %v497_v4, 0.0  ;;  %v436_v54 = vld [vmem:[%s2295_s11 + $0xc0] sm:$0xff]  ;;  %1798 = vmatprep.subr.bf16.mxu1 %v1989_v41  ;;  %v1990_v55 = vld [vmem:[%s2712_s5 + $0x8] sm:$0xff]   ;;  %v1991_v60 = vld [vmem:[%s2712_s5 + $0x50] sm:$0xff]   ;;  %p2061_p5 = pnand %p2060_p4, %p2054_p1 }
  0x37   : > { %1913 = vmatmul.mubr.msk.bf16.vlgmr.msra.gmra.mrb[0].mxu0 %vm593_vm0, %v555_v12  ;;  %v500_v23 = vadd.f32 %v2293_v35, %v461_v15  ;;  %v464_v24 = vmul.f32 %v2288_v34, %v425_v10  ;;  %v465_v25 = vmul.f32 %v2288_v34, %v426_v11  ;;  %v501_v30 = vadd.f32 %v2293_v35, %v462_v18  ;;  %v437_v59 = vld [vmem:[%s2295_s11 + $0xc8] sm:$0xff]  ;;  %v438_v0 = vld [vmem:[%s2295_s11 + $0xd0] sm:$0xff]  ;;  %v439_v1 = vld [vmem:[%s2295_s11 + $0xd8] sm:$0xff] }
  0x38   : > { %1916 = vmatprep.mubr.msk.bf16.mxu0 %vm593_vm0, %v556_v13  ;;  %v530_v28 = vmax.f32 %v498_v16, 0.0  ;;  %v531_v29 = vmax.f32 %v499_v17, 0.0  ;;  %v502_v31 = vadd.f32 %v2293_v35, %v463_v19  ;;  %v466_v38 = vmul.f32 %v2288_v34, %v427_v20  ;;  %v440_v4 = vld [vmem:[%s2295_s11 + $0xe0] sm:$0xff]  ;;  %v1992_v5 = vld [vmem:[%s2712_s5 + $0x10] sm:$0xff]   ;;  %v441_v10 = vld [vmem:[%s2295_s11 + $0xe8] sm:$0xff] }
  0x39   : > { %v503_v37 = vadd.f32 %v2293_v35, %v464_v24  ;;  %v532_v42 = vmax.f32 %v500_v23, 0.0  ;;  %v467_v43 = vmul.f32 %v2288_v34, %v428_v21  ;;  %v557_v45 = vpack.c.bf16 %v529_v22, %v528_v14  ;;  %1799 = vmatpush3.bf16.msra.mxu1 %v1990_v55  ;;  %v1993_v11 = vld [vmem:[%s2712_s5 + $0x58] sm:$0xff]   ;;  %v442_v20 = vld [vmem:[%s2295_s11 + $0xf0] sm:$0xff] }
  0x3a   : > { %v533_v46 = vmax.f32 %v501_v30, 0.0  ;;  %v534_v47 = vmax.f32 %v502_v31, 0.0  ;;  %v468_v48 = vmul.f32 %v2288_v34, %v429_v26  ;;  %v558_v50 = vpack.c.bf16 %v531_v29, %v530_v28  ;;  %1800 = vmatprep.subr.bf16.mxu1 %v1991_v60  ;;  %v443_v30 = vld [vmem:[%s2295_s11 + $0xf8] sm:$0xff] }
  0x3b   : > { %v535_v51 = vmax.f32 %v503_v37, 0.0  ;;  %v2366_v52 = vadd.f32 %v2293_v35, %v465_v25  ;;  %v469_v53 = vmul.f32 %v2288_v34, %v430_v27  ;;  %v2374_v56 = vadd.f32 %v2293_v35, %v466_v38  ;;  %v1994_v25 = vld [vmem:[%s2712_s5 + $0x18] sm:$0xff]  }
  0x3c   : > { %v2377_v57 = vadd.f32 %v2293_v35, %v467_v43  ;;  %v470_v58 = vmul.f32 %v2288_v34, %v431_v32  ;;  %v2385_v61 = vadd.f32 %v2293_v35, %v468_v48  ;;  %v471_v62 = vmul.f32 %v2288_v34, %v432_v39 }
  0x3d   : > { %v472_v63 = vmul.f32 %v2288_v34, %v433_v40  ;;  %v559_v2 = vpack.c.bf16 %v533_v46, %v532_v42  ;;  %v473_v3 = vmul.f32 %v2288_v34, %v434_v44  ;;  %v560_v6 = vpack.c.bf16 %v535_v51, %v534_v47  ;;  %1801 = vmatpush3.bf16.msra.mxu1 %v1992_v5  ;;  %v2002_v5 = vld [vmem:[%s2712_s5 + $0x38] sm:$0xff]  }
  0x3e   : > { %v536_v7 = vmax.f32 %v2366_v52, 0.0  ;;  %v508_v8 = vadd.f32 %v2293_v35, %v469_v53  ;;  %v474_v9 = vmul.f32 %v2288_v34, %v435_v49  ;;  %v537_v12 = vmax.f32 %v2374_v56, 0.0  ;;  %1802 = vmatprep.subr.bf16.mxu1 %v1993_v11  ;;  %v2013_v11 = vld [vmem:[%s2712_s5 + $0x150] sm:$0xff]  }
  0x3f   : > { %1917 = vmatmul.mubr.msk.bf16.gmra.mrb[4].mxu0 %vm593_vm0, %v557_v45  ;;  %v538_v13 = vmax.f32 %v2377_v57, 0.0  ;;  %v509_v14 = vadd.f32 %v2293_v35, %v470_v58  ;;  %v475_v15 = vmul.f32 %v2288_v34, %v436_v54  ;;  %v539_v16 = vmax.f32 %v2385_v61, 0.0 }
  0x40   : > { %1920 = vmatprep.mubr.msk.bf16.mxu0 %vm593_vm0, %v558_v50  ;;  %v510_v17 = vadd.f32 %v2293_v35, %v471_v62  ;;  %v511_v18 = vadd.f32 %v2293_v35, %v472_v63  ;;  %v476_v19 = vmul.f32 %v2288_v34, %v437_v59  ;;  %v512_v21 = vadd.f32 %v2293_v35, %v473_v3  ;;  %v1995_v62 = vld [vmem:[%s2712_s5 + $0x60] sm:$0xff]   ;;  %v2000_v3 = vld [vmem:[%s2712_s5 + $0x30] sm:$0xff]  }
  0x41   : > { %v513_v22 = vadd.f32 %v2293_v35, %v474_v9  ;;  %v477_v23 = vmul.f32 %v2288_v34, %v438_v0  ;;  %v478_v24 = vmul.f32 %v2288_v34, %v439_v1  ;;  %v540_v26 = vmax.f32 %v508_v8, 0.0  ;;  %1803 = vmatpush3.bf16.msra.mxu1 %v1994_v25  ;;  %v1996_v63 = vld [vmem:[%s2712_s5 + $0x20] sm:$0xff]   ;;  %v1997_v0 = vld [vmem:[%s2712_s5 + $0x68] sm:$0xff]  }
  0x42   : > { %v514_v27 = vadd.f32 %v2293_v35, %v475_v15  ;;  %v515_v28 = vadd.f32 %v2293_v35, %v476_v19  ;;  %v479_v29 = vmul.f32 %v2288_v34, %v440_v4  ;;  %v541_v31 = vmax.f32 %v509_v14, 0.0  ;;  %1804 = vmatprep.subr.bf16.mxu1 %v1995_v62  ;;  %v1998_v1 = vld [vmem:[%s2712_s5 + $0x28] sm:$0xff]   ;;  %v2001_v4 = vld [vmem:[%s2712_s5 + $0x78] sm:$0xff]   ;;  %v2005_v8 = vld [vmem:[%s2712_s5 + $0xc0] sm:$0xff]  }
  0x43   : > { %v516_v32 = vadd.f32 %v2293_v35, %v477_v23  ;;  %v517_v33 = vadd.f32 %v2293_v35, %v478_v24  ;;  %v480_v36 = vmul.f32 %v2288_v34, %v441_v10  ;;  %v542_v37 = vmax.f32 %v510_v17, 0.0  ;;  %v2009_v9 = vld [vmem:[%s2712_s5 + $0x148] sm:$0xff]   ;;  %v2018_v14 = vld [vmem:[%s2712_s5 + $0x118] sm:$0xff]   ;;  %v2021_v15 = vld [vmem:[%s2712_s5 + $0x160] sm:$0xff]  }
  0x44   : > { %v543_v38 = vmax.f32 %v511_v18, 0.0  ;;  %v518_v39 = vadd.f32 %v2293_v35, %v479_v29  ;;  %v481_v40 = vmul.f32 %v2288_v34, %v442_v20  ;;  %v544_v41 = vmax.f32 %v512_v21, 0.0  ;;  %v2010_v10 = vld [vmem:[%s2712_s5 + $0x108] sm:$0xff]   ;;  %v2029_v19 = vld [vmem:[%s2712_s5 + $0x170] sm:$0xff]   ;;  %v2033_v21 = vld [vmem:[%s2712_s5 + $0x178] sm:$0xff]  }
  0x45   : > { %v545_v42 = vmax.f32 %v513_v22, 0.0  ;;  %v519_v43 = vadd.f32 %v2293_v35, %v480_v36  ;;  %v482_v44 = vmul.f32 %v2288_v34, %v443_v30  ;;  %v546_v45 = vmax.f32 %v514_v27, 0.0  ;;  %1805 = vmatpush3.bf16.msra.mxu1 %v1996_v63  ;;  %v2025_v17 = vld [vmem:[%s2712_s5 + $0x168] sm:$0xff]   ;;  %v2030_v20 = vld [vmem:[%s2712_s5 + $0x130] sm:$0xff]   ;;  %v2034_v22 = vld [vmem:[%s2712_s5 + $0x138] sm:$0xff]  }
  0x46   : > { %v547_v46 = vmax.f32 %v515_v28, 0.0  ;;  %v520_v47 = vadd.f32 %v2293_v35, %v481_v40  ;;  %v548_v48 = vmax.f32 %v516_v32, 0.0  ;;  %v549_v49 = vmax.f32 %v517_v33, 0.0  ;;  %1806 = vmatprep.subr.bf16.mxu1 %v1997_v0  ;;  %v2026_v18 = vld [vmem:[%s2712_s5 + $0x128] sm:$0xff]   ;;  %v2523_v23 = vld [vmem:[%s2711_s4] ss:$0 sm:$0xff] }
  0x47   : > { %1921 = vmatmul.mubr.msk.bf16.gmra.mrb[8].mxu0 %vm593_vm0, %v559_v2  ;;  %v521_v50 = vadd.f32 %v2293_v35, %v482_v44  ;;  %v550_v51 = vmax.f32 %v518_v39, 0.0  ;;  %v551_v52 = vmax.f32 %v519_v43, 0.0  ;;  %v561_v53 = vpack.c.bf16 %v537_v12, %v536_v7  ;;  %v1999_v2 = vld [vmem:[%s2712_s5 + $0x70] sm:$0xff]   ;;  %v2004_v7 = vld [vmem:[%s2712_s5 + $0x100] sm:$0xff]   ;;  %v2008_v62 = vld [vmem:[%s2712_s5 + $0x88] sm:$0xff]  }
  0x48   : > { %1924 = vmatprep.mubr.msk.bf16.mxu0 %vm593_vm0, %v560_v6  ;;  %v552_v54 = vmax.f32 %v520_v47, 0.0  ;;  %v562_v56 = vpack.c.bf16 %v539_v16, %v538_v13  ;;  %v563_v34 = vpack.c.bf16 %v541_v31, %v540_v26  ;;  %v564_v57 = vpack.c.bf16 %v543_v38, %v542_v37  ;;  %v2003_v6 = vld [vmem:[%s2712_s5 + $0x140] sm:$0xff]   ;;  %v2014_v12 = vld [vmem:[%s2712_s5 + $0x110] sm:$0xff]   ;;  %v2017_v13 = vld [vmem:[%s2712_s5 + $0x158] sm:$0xff]  }
  0x49   : > { %v553_v55 = vmax.f32 %v521_v50, 0.0  ;;  %v565_v58 = vpack.c.bf16 %v545_v42, %v544_v41  ;;  %v566_v59 = vpack.c.bf16 %v547_v46, %v546_v45  ;;  %v567_v35 = vpack.c.bf16 %v549_v49, %v548_v48  ;;  %1807 = vmatpush3.bf16.msra.mxu1 %v1998_v1  ;;  %1852 = vmatprep.subr.bf16.mxu0 %v2003_v6  ;;  %v2022_v16 = vld [vmem:[%s2712_s5 + $0x120] sm:$0xff]   ;;  %v2011_v1 = vld [vmem:[%s2712_s5 + $0xd0] sm:$0xff]  }
  0x4a   : > { %v568_v60 = vpack.c.bf16 %v551_v52, %v550_v51  ;;  %1808 = vmatprep.subr.bf16.mxu1 %v1999_v2  ;;  %1853 = vmatpush3.bf16.msra.mxu0 %v2004_v7 }
  0x4b   : > { %v569_v61 = vpack.c.bf16 %v553_v55, %v552_v54  ;;  %1854 = vmatprep.subr.bf16.mxu0 %v2009_v9  ;;  %v2006_v54 = vld [vmem:[%s2712_s5 + $0x80] sm:$0xff]  }
  0x4d   : > { %1809 = vmatpush3.bf16.msra.mxu1 %v2000_v3 }
  0x4e   : > { %1810 = vmatprep.subr.bf16.mxu1 %v2001_v4  ;;  %1855 = vmatpush3.bf16.msra.mxu0 %v2010_v10 }
  0x4f   : > { %1925 = vmatmul.mubr.msk.bf16.gmra.mrb[12].mxu0 %vm593_vm0, %v561_v53  ;;  %1856 = vmatprep.subr.bf16.mxu0 %v2013_v11 }
  0x50   : > { %1928 = vmatprep.mubr.msk.bf16.mxu0 %vm593_vm0, %v562_v56  ;;  %v2007_v56 = vld [vmem:[%s2712_s5 + $0xc8] sm:$0xff]  }
  0x51   : > { %1811 = vmatpush3.bf16.msra.mxu1 %v2002_v5  ;;  %v2012_v5 = vld [vmem:[%s2712_s5 + $0x90] sm:$0xff]  }
  0x52   : > { %1824 = vmatprep.subr.bf16.mxu1 %v2005_v8  ;;  %1857 = vmatpush3.bf16.msra.mxu0 %v2014_v12  ;;  %v2015_v8 = vld [vmem:[%s2712_s5 + $0xd8] sm:$0xff]  }
  0x53   : > { %1858 = vmatprep.subr.bf16.mxu0 %v2017_v13 }
  0x56   : > { %1859 = vmatpush3.bf16.msra.mxu0 %v2018_v14 }
  0x57   : > { %1929 = vmatmul.mubr.msk.bf16.gmra.mrb[16].mxu0 %vm593_vm0, %v563_v34  ;;  %1860 = vmatprep.subr.bf16.mxu0 %v2021_v15 }
  0x58   : > { %1932 = vmatprep.mubr.msk.bf16.mxu0 %vm593_vm0, %v564_v57 }
  0x5a   : > { %1861 = vmatpush3.bf16.msra.mxu0 %v2022_v16  ;;  %v2016_v16 = vld [vmem:[%s2712_s5 + $0x98] sm:$0xff]  }
  0x5b   : > { %1862 = vmatprep.subr.bf16.mxu0 %v2025_v17 }
  0x5e   : > { %1863 = vmatpush3.bf16.msra.mxu0 %v2026_v18 }
  0x5f   : > { %1933 = vmatmul.mubr.msk.bf16.gmra.mrb[20].mxu0 %vm593_vm0, %v565_v58  ;;  %1864 = vmatprep.subr.bf16.mxu0 %v2029_v19 }
  0x60   : > { %1936 = vmatprep.mubr.msk.bf16.mxu0 %vm593_vm0, %v566_v59 }
  0x62   : > { %1865 = vmatpush3.bf16.msra.mxu0 %v2030_v20  ;;  %v2019_v20 = vld [vmem:[%s2712_s5 + $0xe0] sm:$0xff]  }
  0x63   : > { %1866 = vmatprep.subr.bf16.mxu0 %v2033_v21 }
  0x66   : > { %1867 = vmatpush3.bf16.msra.mxu0 %v2034_v22 }
  0x67   : > { %1937 = vmatmul.mubr.msk.bf16.gmra.mrb[24].mxu0 %vm593_vm0, %v567_v35 }
  0x68   : > { %1940 = vmatprep.mubr.msk.bf16.mxu0 %vm593_vm0, %v568_v60 }
  0x6f   : > { %1941 = vmatmul.mubr.msk.bf16.gmra.mrb[28].mxu0 %vm593_vm0, %v569_v61 }
 0x10a   : > { %v1914_v24 = vpop.f32.mrb[0].mxu0 }
 0x10b   : > { %v685_v25 = vadd.f32 %v1914_v24, %v2523_v23  ;;  %v676_v26 = vpop.f32.mrb[1].mxu0 }
 0x10c   : > { %v677_v27 = vadd.f32 %v2523_v23, %v676_v26  ;;  %v1915_v28 = vpop.f32.mrb[2].mxu0 }
 0x10d   : > { %v688_v29 = vadd.f32 %v1915_v28, %v2523_v23  ;;  %v679_v30 = vpop.f32.mrb[3].mxu0  ;;  %v805_v32 = vmax.f32 %v685_v25, 0.0  ;;  %v2020_v25 = vld [vmem:[%s2712_s5 + $0xa0] sm:$0xff]  }
 0x10e   : > { %v680_v31 = vadd.f32 %v2523_v23, %v679_v30  ;;  %v803_v36 = vmax.f32 %v677_v27, 0.0 }
 0x10f   : > { %v806_v33 = vmax.f32 %v688_v29, 0.0  ;;  %v2023_v29 = vld [vmem:[%s2712_s5 + $0xe8] sm:$0xff]  }
 0x110   : > { %v804_v37 = vmax.f32 %v680_v31, 0.0 }
 0x111   : > { %v836_v38 = vpack.c.bf16 %v806_v33, %v805_v32 }
 0x112   : > { %v835_v39 = vpack.c.bf16 %v804_v37, %v803_v36  ;;  %v1918_v40 = vpop.f32.mrb[4].mxu0 }
 0x113   : > { %v701_v41 = vadd.f32 %v1918_v40, %v2523_v23  ;;  %v692_v42 = vpop.f32.mrb[5].mxu0 }
 0x114   : > { %v693_v43 = vadd.f32 %v2523_v23, %v692_v42  ;;  %v1919_v44 = vpop.f32.mrb[6].mxu0 }
 0x115   : > { %v704_v45 = vadd.f32 %v1919_v44, %v2523_v23  ;;  %v695_v46 = vpop.f32.mrb[7].mxu0  ;;  %v809_v48 = vmax.f32 %v701_v41, 0.0  ;;  %v2027_v41 = vld [vmem:[%s2712_s5 + $0xf0] sm:$0xff]  }
 0x116   : > { %v696_v47 = vadd.f32 %v2523_v23, %v695_v46  ;;  %v807_v50 = vmax.f32 %v693_v43, 0.0  ;;  %v2028_v46 = vld [vmem:[%s2712_s5 + $0xb0] sm:$0xff]  }
 0x117   : > { %v810_v49 = vmax.f32 %v704_v45, 0.0 }
 0x118   : > { %v808_v51 = vmax.f32 %v696_v47, 0.0 }
 0x119   : > { %v838_v52 = vpack.c.bf16 %v810_v49, %v809_v48  ;;  %v2031_v49 = vld [vmem:[%s2712_s5 + $0xf8] sm:$0xff]  }
 0x11a   : > { %v837_v53 = vpack.c.bf16 %v808_v51, %v807_v50  ;;  %v1922_v55 = vpop.f32.mrb[8].mxu0 }
 0x11b   : > { %v717_v34 = vadd.f32 %v1922_v55, %v2523_v23  ;;  %v708_v57 = vpop.f32.mrb[9].mxu0 }
 0x11c   : > { %1427 = vmatprep.mubr.bf16.mxu1 %v837_v53  ;;  %v709_v58 = vadd.f32 %v2523_v23, %v708_v57  ;;  %v1923_v59 = vpop.f32.mrb[10].mxu0 }
 0x11d   : > { %1428 = vmatmul.mubr.bf16.vlgmr.msra.gmra.mrb[0].mxu1 %v835_v39  ;;  %v813_v35 = vmax.f32 %v717_v34, 0.0  ;;  %v720_v60 = vadd.f32 %v1923_v59, %v2523_v23  ;;  %v711_v61 = vpop.f32.mrb[11].mxu0  ;;  %v2024_v39 = vld [vmem:[%s2712_s5 + $0xa8] sm:$0xff]   ;;  %v2032_v34 = vld [vmem:[%s2712_s5 + $0xb8] sm:$0xff]  }
 0x11e   : > { %1825 = vmatpush3.bf16.msra.mxu1 %v2006_v54  ;;  %1435 = vmatprep.mubr.bf16.mxu1 %v838_v52  ;;  %v811_v63 = vmax.f32 %v709_v58, 0.0  ;;  %v712_v0 = vadd.f32 %v2523_v23, %v711_v61  ;;  %v2035_v58 = vld [vmem:[%s2712_s5 + $0x1c0] sm:$0xff]  }
 0x11f   : > { %1826 = vmatprep.subr.bf16.mxu1 %v2007_v56  ;;  %v814_v2 = vmax.f32 %v720_v60, 0.0  ;;  %v2036_v61 = vld [vmem:[%s2712_s5 + $0x180] sm:$0xff]  }
 0x120   : > { %v812_v3 = vmax.f32 %v712_v0, 0.0 }
 0x121   : > { %v2549_v4 = vpack.c.bf16 %v814_v2, %v813_v35 }
 0x122   : > { %1827 = vmatpush3.bf16.msra.mxu1 %v2008_v62  ;;  %v2554_v6 = vpack.c.bf16 %v812_v3, %v811_v63  ;;  %v1926_v7 = vpop.f32.mrb[12].mxu0  ;;  %v2037_v63 = vld [vmem:[%s2712_s5 + $0x1c8] sm:$0xff]  }
 0x123   : > { %1828 = vmatprep.subr.bf16.mxu1 %v2011_v1  ;;  %v733_v9 = vadd.f32 %v1926_v7, %v2523_v23  ;;  %v724_v10 = vpop.f32.mrb[13].mxu0 }
 0x124   : > { %v725_v11 = vadd.f32 %v2523_v23, %v724_v10  ;;  %v1927_v12 = vpop.f32.mrb[14].mxu0 }
 0x125   : > { %1436 = vmatmul.mubr.bf16.gmra.mrb[4].mxu1 %v836_v38  ;;  %v817_v13 = vmax.f32 %v733_v9, 0.0  ;;  %v736_v14 = vadd.f32 %v1927_v12, %v2523_v23  ;;  %v727_v15 = vpop.f32.mrb[15].mxu0  ;;  %v2038_v9 = vld [vmem:[%s2712_s5 + $0x188] sm:$0xff]  }
 0x126   : > { %1829 = vmatpush3.bf16.msra.mxu1 %v2012_v5  ;;  %v815_v17 = vmax.f32 %v725_v11, 0.0  ;;  %v728_v18 = vadd.f32 %v2523_v23, %v727_v15  ;;  %v2040_v15 = vld [vmem:[%s2712_s5 + $0x190] sm:$0xff]  }
 0x127   : > { %1830 = vmatprep.subr.bf16.mxu1 %v2015_v8  ;;  %v818_v19 = vmax.f32 %v736_v14, 0.0 }
 0x128   : > { %v816_v21 = vmax.f32 %v728_v18, 0.0  ;;  %v2041_v18 = vld [vmem:[%s2712_s5 + $0x1d8] sm:$0xff]  }
 0x129   : > { %v842_v22 = vpack.c.bf16 %v818_v19, %v817_v13 }
 0x12a   : > { %1831 = vmatpush3.bf16.msra.mxu1 %v2016_v16  ;;  %v841_v24 = vpack.c.bf16 %v816_v21, %v815_v17  ;;  %v1930_v26 = vpop.f32.mrb[16].mxu0 }
 0x12b   : > { %1832 = vmatprep.subr.bf16.mxu1 %v2019_v20  ;;  %v749_v27 = vadd.f32 %v1930_v26, %v2523_v23  ;;  %v740_v28 = vpop.f32.mrb[17].mxu0 }
 0x12c   : > { %v741_v30 = vadd.f32 %v2523_v23, %v740_v28  ;;  %v1931_v31 = vpop.f32.mrb[18].mxu0  ;;  %1476 = vmatprep.mubr.bf16.mxu1 %v841_v24 }
 0x12d   : > { %v821_v32 = vmax.f32 %v749_v27, 0.0  ;;  %v752_v33 = vadd.f32 %v1931_v31, %v2523_v23  ;;  %v743_v36 = vpop.f32.mrb[19].mxu0  ;;  %v2042_v27 = vld [vmem:[%s2712_s5 + $0x198] sm:$0xff]  }
 0x12e   : > { %1833 = vmatpush3.bf16.msra.mxu1 %v2020_v25  ;;  %v819_v37 = vmax.f32 %v741_v30, 0.0  ;;  %v744_v38 = vadd.f32 %v2523_v23, %v743_v36  ;;  %v2043_v30 = vld [vmem:[%s2712_s5 + $0x1e0] sm:$0xff]  }
 0x12f   : > { %v822_v40 = vmax.f32 %v752_v33, 0.0  ;;  %1834 = vmatprep.subr.bf16.mxu1 %v2023_v29  ;;  %v2044_v33 = vld [vmem:[%s2712_s5 + $0x1a0] sm:$0xff]  }
 0x130   : > { %v820_v42 = vmax.f32 %v744_v38, 0.0  ;;  %v2047_v38 = vld [vmem:[%s2712_s5 + $0x1f0] sm:$0xff]  }
 0x131   : > { %v844_v43 = vpack.c.bf16 %v822_v40, %v821_v32  ;;  %v2049_v40 = vld [vmem:[%s2712_s5 + $0x1f8] sm:$0xff]  }
 0x132   : > { %v843_v44 = vpack.c.bf16 %v820_v42, %v819_v37  ;;  %1835 = vmatpush3.bf16.msra.mxu1 %v2024_v39  ;;  %v1934_v45 = vpop.f32.mrb[20].mxu0  ;;  %v2045_v37 = vld [vmem:[%s2712_s5 + $0x1e8] sm:$0xff]   ;;  %v2048_v39 = vld [vmem:[%s2712_s5 + $0x1b0] sm:$0xff]  }
 0x133   : > { %v765_v47 = vadd.f32 %v1934_v45, %v2523_v23  ;;  %v756_v48 = vpop.f32.mrb[21].mxu0  ;;  %1836 = vmatprep.subr.bf16.mxu1 %v2027_v41  ;;  %v2050_v41 = vld [vmem:[%s2712_s5 + $0x1b8] sm:$0xff]  }
 0x134   : > { %v757_v50 = vadd.f32 %v2523_v23, %v756_v48  ;;  %v1935_v51 = vpop.f32.mrb[22].mxu0 }
 0x135   : > { %v825_v52 = vmax.f32 %v765_v47, 0.0  ;;  %v768_v53 = vadd.f32 %v1935_v51, %v2523_v23  ;;  %v759_v54 = vpop.f32.mrb[23].mxu0 }
 0x136   : > { %v823_v55 = vmax.f32 %v757_v50, 0.0  ;;  %v760_v56 = vadd.f32 %v2523_v23, %v759_v54  ;;  %1837 = vmatpush3.bf16.msra.mxu1 %v2028_v46 }
 0x137   : > { %v826_v57 = vmax.f32 %v768_v53, 0.0  ;;  %1838 = vmatprep.subr.bf16.mxu1 %v2031_v49 }
 0x138   : > { %v824_v59 = vmax.f32 %v760_v56, 0.0 }
 0x139   : > { %v846_v35 = vpack.c.bf16 %v826_v57, %v825_v52 }
 0x13a   : > { %v845_v60 = vpack.c.bf16 %v824_v59, %v823_v55  ;;  %1839 = vmatpush3.bf16.msra.mxu1 %v2032_v34  ;;  %v1938_v62 = vpop.f32.mrb[24].mxu0 }
 0x13b   : > { %1880 = vmatprep.subr.bf16.mxu1 %v2035_v58  ;;  %v781_v0 = vadd.f32 %v1938_v62, %v2523_v23  ;;  %v772_v1 = vpop.f32.mrb[25].mxu0 }
 0x13c   : > { %1525 = vmatprep.mubr.bf16.mxu0 %v845_v60  ;;  %v773_v2 = vadd.f32 %v2523_v23, %v772_v1  ;;  %v1939_v3 = vpop.f32.mrb[26].mxu0 }
 0x13d   : > { %1477 = vmatmul.mubr.bf16.vlgmr.msra.gmra.mrb[8].mxu1 %v2554_v6  ;;  %1526 = vmatmul.mubr.bf16.vlgmr.msra.gmra.mrb[32].mxu0 %v843_v44  ;;  %v829_v5 = vmax.f32 %v781_v0, 0.0  ;;  %v784_v7 = vadd.f32 %v1939_v3, %v2523_v23  ;;  %v775_v8 = vpop.f32.mrb[27].mxu0  ;;  %v2039_v6 = vld [vmem:[%s2712_s5 + $0x1d0] sm:$0xff]  }
 0x13e   : > { %1484 = vmatprep.mubr.bf16.mxu1 %v842_v22  ;;  %1881 = vmatpush3.bf16.msra.mxu1 %v2036_v61  ;;  %v827_v10 = vmax.f32 %v773_v2, 0.0  ;;  %v776_v11 = vadd.f32 %v2523_v23, %v775_v8 }
 0x13f   : > { %1882 = vmatprep.subr.bf16.mxu1 %v2037_v63  ;;  %1533 = vmatprep.mubr.bf16.mxu0 %v846_v35  ;;  %v830_v12 = vmax.f32 %v784_v7, 0.0 }
 0x140   : > { %v828_v13 = vmax.f32 %v776_v11, 0.0 }
 0x141   : > { %v848_v14 = vpack.c.bf16 %v830_v12, %v829_v5 }
 0x142   : > { %1883 = vmatpush3.bf16.msra.mxu1 %v2038_v9  ;;  %v847_v16 = vpack.c.bf16 %v828_v13, %v827_v10  ;;  %v1942_v17 = vpop.f32.mrb[28].mxu0 }
 0x143   : > { %1884 = vmatprep.subr.bf16.mxu1 %v2039_v6  ;;  %v797_v19 = vadd.f32 %v1942_v17, %v2523_v23  ;;  %v788_v20 = vpop.f32.mrb[29].mxu0 }
 0x144   : > { %v789_v21 = vadd.f32 %v2523_v23, %v788_v20  ;;  %v1943_v22 = vpop.f32.mrb[30].mxu0 }
 0x145   : > { %1485 = vmatmul.mubr.bf16.gmra.mrb[12].mxu1 %v2549_v4  ;;  %1534 = vmatmul.mubr.bf16.gmra.mrb[36].mxu0 %v844_v43  ;;  %v833_v24 = vmax.f32 %v797_v19, 0.0  ;;  %v800_v25 = vadd.f32 %v1943_v22, %v2523_v23  ;;  %v791_v26 = vpop.f32.mrb[31].mxu0 }
 0x146   : > { %1885 = vmatpush3.bf16.msra.mxu1 %v2040_v15  ;;  %v831_v28 = vmax.f32 %v789_v21, 0.0  ;;  %v792_v29 = vadd.f32 %v2523_v23, %v791_v26  ;;  %v2046_v23 = vld [vmem:[%s2712_s5 + $0x1a8] sm:$0xff]  }
 0x147   : > { %1886 = vmatprep.subr.bf16.mxu1 %v2041_v18  ;;  %v834_v31 = vmax.f32 %v800_v25, 0.0 }
 0x148   : > { %v832_v4 = vmax.f32 %v792_v29, 0.0 }
 0x149   : > { %v850_v32 = vpack.c.bf16 %v834_v31, %v833_v24 }
 0x14a   : > { %1887 = vmatpush3.bf16.msra.mxu1 %v2042_v27  ;;  %v849_v36 = vpack.c.bf16 %v832_v4, %v831_v28 }
 0x14b   : > { %1888 = vmatprep.subr.bf16.mxu1 %v2043_v30 }
 0x14c   : > { %1574 = vmatprep.mubr.bf16.mxu1 %v849_v36 }
 0x14e   : > { %1889 = vmatpush3.bf16.msra.mxu1 %v2044_v33 }
 0x14f   : > { %1890 = vmatprep.subr.bf16.mxu1 %v2045_v37 }
 0x152   : > { %1891 = vmatpush3.bf16.msra.mxu1 %v2046_v23 }
 0x153   : > { %1892 = vmatprep.subr.bf16.mxu1 %v2047_v38 }
 0x156   : > { %1893 = vmatpush3.bf16.msra.mxu1 %v2048_v39 }
 0x157   : > { %1894 = vmatprep.subr.bf16.mxu1 %v2049_v40 }
 0x15a   : > { %1895 = vmatpush3.bf16.msra.mxu1 %v2050_v41 }
 0x15d   : > { %1575 = vmatmul.mubr.bf16.vlgmr.msra.gmra.mrb[16].mxu1 %v847_v16 }
 0x15e   : > { %1582 = vmatprep.mubr.bf16.mxu1 %v850_v32 }
 0x165   : > { %1583 = vmatmul.mubr.bf16.gmra.mrb[20].mxu1 %v848_v14 }
 0x1f0   : > { %v1812_v42 = vpop.f32.mrb[0].mxu1 }
 0x1f1   : > { %v1813_v43 = vpop.f32.mrb[1].mxu1 }
 0x1f2   : > { %v1814_v44 = vadd.f32 %v1813_v43, %v1812_v42  ;;  %v1815_v45 = vpop.f32.mrb[2].mxu1 }
 0x1f3   : > { %v1816_v46 = vpop.f32.mrb[3].mxu1 }
 0x1f4   : > { %v1817_v47 = vadd.f32 %v1816_v46, %v1815_v45 }
 0x1f8   : > { %v1818_v48 = vpop.f32.mrb[4].mxu1 }
 0x1f9   : > { %v1819_v49 = vpop.f32.mrb[5].mxu1 }
 0x1fa   : > { %v1820_v50 = vadd.f32 %v1819_v49, %v1818_v48  ;;  %v1821_v51 = vpop.f32.mrb[6].mxu1 }
 0x1fb   : > { %v1822_v52 = vpop.f32.mrb[7].mxu1 }
 0x1fc   : > { %v1823_v53 = vadd.f32 %v1822_v52, %v1821_v51 }
 0x210   : > { %v1840_v54 = vpop.f32.mrb[8].mxu1  ;;  %v1868_v55 = vpop.f32.mrb[32].mxu0 }
 0x211   : > { %v1841_v56 = vpop.f32.mrb[9].mxu1  ;;  %v1869_v34 = vpop.f32.mrb[33].mxu0 }
 0x212   : > { %v1842_v57 = vadd.f32 %v1841_v56, %v1840_v54  ;;  %v1843_v58 = vpop.f32.mrb[10].mxu1  ;;  %v1870_v59 = vadd.f32 %v1869_v34, %v1868_v55  ;;  %v1871_v35 = vpop.f32.mrb[34].mxu0 }
 0x213   : > { %v1844_v60 = vpop.f32.mrb[11].mxu1  ;;  %v1872_v61 = vpop.f32.mrb[35].mxu0 }
 0x214   : > { %v1479_v62 = vadd.f32 %v1842_v57, %v1814_v44  ;;  %v1845_v63 = vadd.f32 %v1844_v60, %v1843_v58  ;;  %v1873_v0 = vadd.f32 %v1872_v61, %v1871_v35 }
 0x216   : > { %v1528_v1 = vadd.f32 %v1870_v59, %v1479_v62  ;;  %v1482_v2 = vadd.f32 %v1845_v63, %v1817_v47 }
 0x218   : > { %v1531_v3 = vadd.f32 %v1873_v0, %v1482_v2  ;;  %v1846_v5 = vpop.f32.mrb[12].mxu1  ;;  %v1874_v7 = vpop.f32.mrb[36].mxu0 }
 0x219   : > { %v1847_v8 = vpop.f32.mrb[13].mxu1  ;;  %v1875_v9 = vpop.f32.mrb[37].mxu0 }
 0x21a   : > { %v1848_v10 = vadd.f32 %v1847_v8, %v1846_v5  ;;  %v1849_v11 = vpop.f32.mrb[14].mxu1  ;;  %v1876_v6 = vadd.f32 %v1875_v9, %v1874_v7  ;;  %v1877_v12 = vpop.f32.mrb[38].mxu0 }
 0x21b   : > { %v1850_v13 = vpop.f32.mrb[15].mxu1  ;;  %v1878_v14 = vpop.f32.mrb[39].mxu0 }
 0x21c   : > { %v1487_v15 = vadd.f32 %v1848_v10, %v1820_v50  ;;  %v1851_v16 = vadd.f32 %v1850_v13, %v1849_v11  ;;  %v1879_v17 = vadd.f32 %v1878_v14, %v1877_v12 }
 0x21e   : > { %v1536_v18 = vadd.f32 %v1876_v6, %v1487_v15  ;;  %v1490_v19 = vadd.f32 %v1851_v16, %v1823_v53 }
 0x220   : > { %v1539_v20 = vadd.f32 %v1879_v17, %v1490_v19 }
 0x230   : > { %v1896_v21 = vpop.f32.mrb[16].mxu1 }
 0x231   : > { %v1897_v22 = vpop.f32.mrb[17].mxu1 }
 0x232   : > { %v1898_v24 = vadd.f32 %v1897_v22, %v1896_v21  ;;  %v1899_v25 = vpop.f32.mrb[18].mxu1 }
 0x233   : > { %v1900_v26 = vpop.f32.mrb[19].mxu1 }
 0x234   : > { %v1577_v27 = vadd.f32 %v1898_v24, %v1528_v1  ;;  %v1901_v28 = vadd.f32 %v1900_v26, %v1899_v25 }
 0x236   : > { %1591 = vst [vmem:[%s408_s17] sm:$0xff] %v1577_v27  ;;  %v1580_v29 = vadd.f32 %v1901_v28, %v1531_v3 }
 0x238   : > { %1592 = vst [vmem:[%s408_s17 + $0x8] sm:$0xff] %v1580_v29  ;;  %v1902_v30 = vpop.f32.mrb[20].mxu1 }
 0x239   : > { %v1903_v31 = vpop.f32.mrb[21].mxu1 }
 0x23a   : > { %v1904_v4 = vadd.f32 %v1903_v31, %v1902_v30  ;;  %v1905_v32 = vpop.f32.mrb[22].mxu1 }
 0x23b   : > { %v1906_v33 = vpop.f32.mrb[23].mxu1 }
 0x23c   : > { %v1585_v36 = vadd.f32 %v1904_v4, %v1536_v18  ;;  %v1907_v37 = vadd.f32 %v1906_v33, %v1905_v32 }
 0x23e   : > { %1593 = vst [vmem:[%s408_s17 + $0x10] sm:$0xff] %v1585_v36  ;;  %v1588_v23 = vadd.f32 %v1907_v37, %v1539_v20 }
 0x240   : > { %1594 = vst [vmem:[%s408_s17 + $0x18] sm:$0xff] %v1588_v23 }
 0x241   : > { %2064 = shalt.err (!%p2061_p5)
}
 0x242   : > { %s2065_s14 = scalar_lea.hbm %s2664_s29, 512  ;;  %s2069_s16 = scalar_lea.hbm %s2713_s6, 2048 }
 0x243   : > { %p2066_p7 = scmp.ne.s32.totalorder %s2664_s29, %s2065_s14  ;;  %p2070_p11 = scmp.lt.u32.totalorder %s2664_s29, %s2713_s6 }
 0x244   : > { %p2071_p12 = scmp.lt.u32.totalorder %s2069_s16, %s2065_s14  ;;  %p2073_p0 = scmp.lt.u32.totalorder %s2065_s14, %s2664_s29 }
 0x245   : > { %p2067_p9 = pnand %p2066_p7, %p2191_p6 }
 0x246   : > { %p2072_p13 = por %p2071_p12, %p2070_p11 }
 0x247   : > { %p2068_p10 = pneg %p2067_p9 }
 0x248   : > { %p2074_p1 = por %p2073_p0, %p2072_p13 }
 0x24a   : > { %p2075_p2 = pnand %p2074_p1, %p2068_p10 }
 0x24c   : > { %2078 = shalt.err (!%p2075_p2)
}
 0x24d   : > { %s2116_s26 = smov 128   ;;  %s2117_s28 = smov 8  }
 0x24e   : > { %1944 = dma.vmem_to_hbm [thread:$0]  (%p2191_p6), %s2659_s19, 512, %s2664_s29, %s1596_s9, %s2116_s26, %s2116_s26, %s2117_s28  }
 0x24f PF: > { %p1950_p3 = scmp.ge.s32.totalorder %s2113_s24, 2  ;;  %s1624_s10 = sand.u32 1, %s2101_s21  }
 0x250   : > { %s1625_s25 = scalar_lea.sflag [#allocation5], %s1624_s10 }
 0x251   : > { %p1947_p4 = pnand %p1950_p3, %p2195_p8 }
 0x253   : > { %2096 = dma.done.wait (!%p1947_p4), %s1625_s25, 512  }
 0x254   : > { %2098 = vsyncadd (!%p1947_p4), %s1625_s25, 4294966784  ;;  %p16_p5 = scmp.ge.s32.totalorder %s2176_s27, 6   ;;  %s2716_s21 = smov %s2105_s22 }
 0x255   : > { %s2717_s22 = smov %s2109_s23  ;;  %s2718_s23 = smov %s2189_s30 }
 0x256   : > { %s2719_s24 = smov %s2176_s27  ;;  %18 = sbr.rel (!%p16_p5) target bundleno = 3 (0x3), region = 122 }
 0x25d   :  { %1630 = vsyncpa [#allocation5], 1 }
 0x25e   :  { %1632 = vsyncpa [#allocation5 + $0x1], 1 }

</bundles_post_ra>
